<compile_context>
chip_gen: v7x
topology: tpu7x:2x2x1
jax: 0.10.0
libtpu: 0.0.40
codegen_flags: <defaults>
</compile_context>

<pallas_src>
import functools
import math

import jax
import jax.numpy as jnp
from jax.experimental import pallas as pl
from jax.experimental.pallas import tpu as pltpu


# ---------------------------------------------------------------------------
# Kernel: one grid step = (batch element b, encoder layer l)
# ---------------------------------------------------------------------------
def encoder_kernel(x_ref, win_ref, wm_ref, vec_ref, vf_ref, o_ref, act_ref,
                   *, n_heads: int, d_model: int, d_ff: int):
    D, F, H = d_model, d_ff, n_heads
    dh = D // H
    scale = 1.0 / math.sqrt(dh)
    eps = 1e-5

    layer = pl.program_id(1)
    n_layers = pl.num_programs(1)

    def layer_norm(v, g, b):
        mu = jnp.mean(v, axis=-1, keepdims=True)
        var = jnp.mean((v - mu) ** 2, axis=-1, keepdims=True)
        return (v - mu) * jax.lax.rsqrt(var + eps) * g + b

    # Layer 0: load this batch element's activation into the VMEM carry.
    @pl.when(layer == 0)
    def _():
        act_ref[...] = x_ref[...].astype(jnp.float32)

    x = act_ref[...]                       # (L, D) f32
    x_bf = x.astype(jnp.bfloat16)          # MXU operand dtype

    # Per-layer vector slab: [b_o | b_ff1 | b_ff2 | g1 | be1 | g2 | be2]  (all f32)
    bo = vec_ref[:, 0:D]
    b1 = vec_ref[:, D:D + F]
    b2 = vec_ref[:, D + F:2 * D + F]
    g1 = vec_ref[:, 2 * D + F:3 * D + F]
    be1 = vec_ref[:, 3 * D + F:4 * D + F]
    g2 = vec_ref[:, 4 * D + F:5 * D + F]
    be2 = vec_ref[:, 5 * D + F:6 * D + F]

    # ---- multi-head self-attention ----------------------------------------
    ctx_heads = []
    for h in range(H):                                   # static unroll over heads
        def proj(role, h=h):
            j = role * H + h                             # head-major: leading-dim slice = free
            w = win_ref[j, 0:D, :]                       # (D, dh)  bf16
            b = win_ref[j, D:D + 1, :]                   # (1, dh)  bf16 (bias row)
            return (jnp.dot(x_bf, w, preferred_element_type=jnp.float32)
                    + b.astype(jnp.float32))

        qh, kh, vh = proj(0), proj(1), proj(2)           # (L, dh) f32 each

        # Q.K^T: contract the last axes directly (no explicit transpose / XLU copy).
        s = jax.lax.dot_general(
            qh.astype(jnp.bfloat16), kh.astype(jnp.bfloat16),
            dimension_numbers=(((1,), (1,)), ((), ())),
            preferred_element_type=jnp.float32) * scale  # (L, L)
        s = s - jnp.max(s, axis=-1, keepdims=True)
        p = jnp.exp(s)
        p = p * pl.reciprocal(jnp.sum(p, axis=-1, keepdims=True), approx=True)
        ctx_heads.append(jnp.dot(p.astype(jnp.bfloat16), vh.astype(jnp.bfloat16),
                                 preferred_element_type=jnp.float32))  # (L, dh)

    ctx = jnp.concatenate(ctx_heads, axis=-1)            # (L, D): one lane-concat per layer
    wo = wm_ref[0, :, 0:D]                               # (D, D) bf16
    attn = jnp.dot(ctx.astype(jnp.bfloat16), wo,
                   preferred_element_type=jnp.float32) + bo

    # ---- residual + LayerNorm1 ---------------------------------------------
    x = layer_norm(x + attn, g1, be1)

    # ---- position-wise FFN (Conv1d kernel_size=1 == per-token Linear) ------
    w1 = wm_ref[1, :, 0:F]                               # (D, F) bf16
    h1 = jnp.dot(x.astype(jnp.bfloat16), w1, preferred_element_type=jnp.float32) + b1
    h1 = jnp.maximum(h1, 0.0)
    w2t = wm_ref[2, :, 0:F]                              # (D, F) = W_ff2^T  bf16
    ff = jax.lax.dot_general(
        h1.astype(jnp.bfloat16), w2t,
        dimension_numbers=(((1,), (1,)), ((), ())),
        preferred_element_type=jnp.float32) + b2         # (L, D)

    # ---- residual + LayerNorm2 ---------------------------------------------
    x = layer_norm(x + ff, g2, be2)
    act_ref[...] = x

    # ---- final encoder LayerNorm, written once on the last layer -----------
    @pl.when(layer == n_layers - 1)
    def _():
        gf = vf_ref[:, 0:D]
        bf = vf_ref[:, D:2 * D]
        o_ref[...] = layer_norm(x, gf, bf).astype(o_ref.dtype)


# ---------------------------------------------------------------------------
# Wrapper: pack weights, set up grid / BlockSpecs, launch
# ---------------------------------------------------------------------------
def encoder_forward(x, layer_params, norm_gamma, norm_beta, n_heads,
                    mxu_dtype=jnp.bfloat16):
    B, L, D = x.shape
    N = len(layer_params)
    F = layer_params[0]["w1"].shape[1]
    H = n_heads
    assert D % H == 0
    dh = D // H
    PW = max(D, F)                                       # lane-pad width for the matrix slab

    def head_major(w, b):
        # (D, D) weight + (1, D) bias  ->  (H, D+1, dh), bias as the last row.
        w3 = w.reshape(D, H, dh).transpose(1, 0, 2)      # (H, D, dh)
        b3 = b.reshape(1, H, dh).transpose(1, 0, 2)      # (H, 1, dh)
        return jnp.concatenate([w3, b3], axis=1)         # (H, D+1, dh)

    w_in = jnp.stack([
        jnp.concatenate([head_major(p["wq"], p["bq"]),
                         head_major(p["wk"], p["bk"]),
                         head_major(p["wv"], p["bv"])], axis=0)   # (3H, D+1, dh)
        for p in layer_params
    ]).astype(mxu_dtype)                                 # (N, 3H, D+1, dh)

    def pad_cols(w):
        return jnp.pad(w, ((0, 0), (0, PW - w.shape[1])))

    w_mats = jnp.stack([
        jnp.stack([pad_cols(p["wo"]), pad_cols(p["w1"]), pad_cols(p["w2"].T)], axis=0)
        for p in layer_params
    ]).astype(mxu_dtype)                                 # (N, 3, D, PW)

    vec = jnp.stack([
        jnp.concatenate([p["bo"], p["b1"], p["b2"],
                         p["ln1_g"], p["ln1_b"], p["ln2_g"], p["ln2_b"]], axis=-1)
        for p in layer_params
    ]).astype(jnp.float32)                               # (N, 1, 6D+F)

    vec_f = jnp.concatenate([norm_gamma, norm_beta], axis=-1).astype(jnp.float32)  # (1, 2D)

    kernel = functools.partial(encoder_kernel, n_heads=H, d_model=D, d_ff=F)

    out = pl.pallas_call(
        kernel,
        out_shape=jax.ShapeDtypeStruct((B, L, D), x.dtype),
        grid_spec=pltpu.PrefetchScalarGridSpec(
            num_scalar_prefetch=0,
            grid=(B, N),                                 # (batch: parallel, layer: arbitrary)
            in_specs=[
                pl.BlockSpec((None, L, D), lambda b, l: (b, 0, 0)),
                pl.BlockSpec((None, 3 * H, D + 1, dh), lambda b, l: (l, 0, 0, 0)),
                pl.BlockSpec((None, 3, D, PW), lambda b, l: (l, 0, 0, 0)),
                pl.BlockSpec((None, 1, 6 * D + F), lambda b, l: (l, 0, 0)),
                pl.BlockSpec((1, 2 * D), lambda b, l: (0, 0)),
            ],
            out_specs=pl.BlockSpec((None, L, D), lambda b, l: (b, 0, 0)),
            scratch_shapes=[pltpu.VMEM((L, D), jnp.float32)],   # activation carried over layers
        ),
        compiler_params=pltpu.CompilerParams(
            dimension_semantics=("parallel", "arbitrary"),
            vmem_limit_bytes=32 * 1024 * 1024,
        ),
    )(x, w_in, w_mats, vec, vec_f)
    return out


# ---------------------------------------------------------------------------
# Pure-JAX reference (for correctness check)
# ---------------------------------------------------------------------------
def ref_encoder(x, layer_params, norm_gamma, norm_beta, n_heads):
    def ln(v, g, b):
        mu = jnp.mean(v, axis=-1, keepdims=True)
        var = jnp.mean((v - mu) ** 2, axis=-1, keepdims=True)
        return (v - mu) * jax.lax.rsqrt(var + 1e-5) * g + b

    for p in layer_params:
        B, L, D = x.shape
        H = n_heads
        dh = D // H
        q = (x @ p["wq"] + p["bq"]).reshape(B, L, H, dh)
        k = (x @ p["wk"] + p["bk"]).reshape(B, L, H, dh)
        v = (x @ p["wv"] + p["bv"]).reshape(B, L, H, dh)
        s = jnp.einsum("blhe,bshe->bhls", q, k) / math.sqrt(dh)
        a = jax.nn.softmax(s, axis=-1)
        ctx = jnp.einsum("bhls,bshd->blhd", a, v).reshape(B, L, D)
        attn_out = ctx @ p["wo"] + p["bo"]
        x = ln(x + attn_out, p["ln1_g"], p["ln1_b"])
        ff = jnp.maximum(x @ p["w1"] + p["b1"], 0.0) @ p["w2"] + p["b2"]
        x = ln(x + ff, p["ln2_g"], p["ln2_b"])
    return ln(x, norm_gamma, norm_beta)


# ---------------------------------------------------------------------------
# Main
# ---------------------------------------------------------------------------
if __name__ == "__main__":
    B, L, D, H, F, N_LAYERS = 2, 8, 32, 4, 64, 2

    key = jax.random.PRNGKey(0)

    def make_layer_params(k):
        ks = jax.random.split(k, 6)
        return {
            "wq": 0.02 * jax.random.normal(ks[0], (D, D), jnp.float32),
            "wk": 0.02 * jax.random.normal(ks[1], (D, D), jnp.float32),
            "wv": 0.02 * jax.random.normal(ks[2], (D, D), jnp.float32),
            "wo": 0.02 * jax.random.normal(ks[3], (D, D), jnp.float32),
            "bq": jnp.zeros((1, D), jnp.float32),
            "bk": jnp.zeros((1, D), jnp.float32),
            "bv": jnp.zeros((1, D), jnp.float32),
            "bo": jnp.zeros((1, D), jnp.float32),
            "w1": 0.02 * jax.random.normal(ks[4], (D, F), jnp.float32),
            "b1": jnp.zeros((1, F), jnp.float32),
            "w2": 0.02 * jax.random.normal(ks[5], (F, D), jnp.float32),
            "b2": jnp.zeros((1, D), jnp.float32),
            "ln1_g": jnp.ones((1, D), jnp.float32),
            "ln1_b": jnp.zeros((1, D), jnp.float32),
            "ln2_g": jnp.ones((1, D), jnp.float32),
            "ln2_b": jnp.zeros((1, D), jnp.float32),
        }

    key, *layer_keys = jax.random.split(key, N_LAYERS + 1)
    layer_params = [make_layer_params(k) for k in layer_keys]
    norm_gamma = jnp.ones((1, D), jnp.float32)
    norm_beta = jnp.zeros((1, D), jnp.float32)

    key, xk = jax.random.split(key)
    x = jax.random.normal(xk, (B, L, D), jnp.float32)

    out = encoder_forward(x, layer_params, norm_gamma, norm_beta, H)
    out = jax.block_until_ready(out)

    ref = ref_encoder(x, layer_params, norm_gamma, norm_beta, H)
    assert out.shape == (B, L, D)
    # tolerance covers bf16 MXU operands + approximate EUP reciprocal in the softmax
    assert jnp.allclose(out, ref, rtol=2e-2, atol=2e-2), "mismatch vs reference"

    print("KERNEL_OK")
</pallas_src>

<mosaic_0001>
module attributes {stable_mosaic.version = 11 : i64} {
  func.func @encoder_kernel(%arg0: i32, %arg1: i32, %arg2: memref<1x8x32xf32, #tpu.memory_space<vmem>>, %arg3: memref<1x12x33x8xbf16, #tpu.memory_space<vmem>>, %arg4: memref<1x3x32x64xbf16, #tpu.memory_space<vmem>>, %arg5: memref<1x1x256xf32, #tpu.memory_space<vmem>>, %arg6: memref<1x64xf32, #tpu.memory_space<vmem>>, %arg7: memref<1x8x32xf32, #tpu.memory_space<vmem>>, %arg8: memref<8x32xf32, #tpu.memory_space<vmem>>) attributes {dimension_semantics = [#tpu.dimension_semantics<parallel>, #tpu.dimension_semantics<arbitrary>], iteration_bounds = array<i64: 2, 2>, scalar_prefetch = 0 : i64, scratch_operands = 1 : i64, tpu.core_type = #tpu.core_type<tc>, window_params = [{transform_indices = @transform_0, window_bounds = array<i64: 1, 8, 32>}, {transform_indices = @transform_1, window_bounds = array<i64: 1, 12, 33, 8>}, {transform_indices = @transform_2, window_bounds = array<i64: 1, 3, 32, 64>}, {transform_indices = @transform_3, window_bounds = array<i64: 1, 1, 256>}, {pipeline_mode = #tpu.pipeline_mode<synchronous>, transform_indices = @transform_4, window_bounds = array<i64: 1, 64>}, {transform_indices = @transform_5, window_bounds = array<i64: 1, 8, 32>}]} {
    %c0_i32 = arith.constant 0 : i32
    %0 = arith.cmpi eq, %arg1, %c0_i32 : i32
    %1 = arith.extui %0 : i1 to i32
    %c0_i32_0 = arith.constant 0 : i32
    %2 = arith.cmpi ne, %1, %c0_i32_0 : i32
    scf.if %2 {
      %c0_162 = arith.constant 0 : index
      %c0_163 = arith.constant 0 : index
      %c0_164 = arith.constant 0 : index
      %258 = vector.load %arg2[%c0_162, %c0_163, %c0_164] : memref<1x8x32xf32, #tpu.memory_space<vmem>>, vector<1x8x32xf32>
      %259 = vector.shape_cast %258 : vector<1x8x32xf32> to vector<8x32xf32>
      %c0_165 = arith.constant 0 : index
      %c0_166 = arith.constant 0 : index
      %260 = vector.load %arg8[%c0_165, %c0_166] : memref<8x32xf32, #tpu.memory_space<vmem>>, vector<8x32xf32>
      tpu.vector_store %arg8[%c0_165, %c0_166], %259 {strides = array<i32>} : memref<8x32xf32, #tpu.memory_space<vmem>>, vector<8x32xf32>,
    } else {
    }
    %c0 = arith.constant 0 : index
    %c0_1 = arith.constant 0 : index
    %3 = vector.load %arg8[%c0, %c0_1] : memref<8x32xf32, #tpu.memory_space<vmem>>, vector<8x32xf32>
    %4 = arith.truncf %3 : vector<8x32xf32> to vector<8x32xbf16>
    %c0_2 = arith.constant 0 : index
    %c0_3 = arith.constant 0 : index
    %c0_4 = arith.constant 0 : index
    %5 = vector.load %arg5[%c0_2, %c0_3, %c0_4] : memref<1x1x256xf32, #tpu.memory_space<vmem>>, vector<1x1x32xf32>
    %6 = vector.shape_cast %5 : vector<1x1x32xf32> to vector<1x32xf32>
    %c0_5 = arith.constant 0 : index
    %c0_6 = arith.constant 0 : index
    %c32 = arith.constant 32 : index
    %7 = vector.load %arg5[%c0_5, %c0_6, %c32] : memref<1x1x256xf32, #tpu.memory_space<vmem>>, vector<1x1x64xf32>
    %8 = vector.shape_cast %7 : vector<1x1x64xf32> to vector<1x64xf32>
    %c0_7 = arith.constant 0 : index
    %c0_8 = arith.constant 0 : index
    %c96 = arith.constant 96 : index
    %9 = vector.load %arg5[%c0_7, %c0_8, %c96] : memref<1x1x256xf32, #tpu.memory_space<vmem>>, vector<1x1x32xf32>
    %10 = vector.shape_cast %9 : vector<1x1x32xf32> to vector<1x32xf32>
    %c0_9 = arith.constant 0 : index
    %c0_10 = arith.constant 0 : index
    %c128 = arith.constant 128 : index
    %11 = vector.load %arg5[%c0_9, %c0_10, %c128] : memref<1x1x256xf32, #tpu.memory_space<vmem>>, vector<1x1x32xf32>
    %12 = vector.shape_cast %11 : vector<1x1x32xf32> to vector<1x32xf32>
    %c0_11 = arith.constant 0 : index
    %c0_12 = arith.constant 0 : index
    %c160 = arith.constant 160 : index
    %13 = vector.load %arg5[%c0_11, %c0_12, %c160] : memref<1x1x256xf32, #tpu.memory_space<vmem>>, vector<1x1x32xf32>
    %14 = vector.shape_cast %13 : vector<1x1x32xf32> to vector<1x32xf32>
    %c0_13 = arith.constant 0 : index
    %c0_14 = arith.constant 0 : index
    %c192 = arith.constant 192 : index
    %15 = vector.load %arg5[%c0_13, %c0_14, %c192] : memref<1x1x256xf32, #tpu.memory_space<vmem>>, vector<1x1x32xf32>
    %16 = vector.shape_cast %15 : vector<1x1x32xf32> to vector<1x32xf32>
    %c0_15 = arith.constant 0 : index
    %c0_16 = arith.constant 0 : index
    %c224 = arith.constant 224 : index
    %17 = vector.load %arg5[%c0_15, %c0_16, %c224] : memref<1x1x256xf32, #tpu.memory_space<vmem>>, vector<1x1x32xf32>
    %18 = vector.shape_cast %17 : vector<1x1x32xf32> to vector<1x32xf32>
    %c0_17 = arith.constant 0 : index
    %c0_18 = arith.constant 0 : index
    %c0_19 = arith.constant 0 : index
    %c0_20 = arith.constant 0 : index
    %19 = vector.load %arg3[%c0_17, %c0_18, %c0_19, %c0_20] : memref<1x12x33x8xbf16, #tpu.memory_space<vmem>>, vector<1x1x32x8xbf16>
    %20 = vector.shape_cast %19 : vector<1x1x32x8xbf16> to vector<32x8xbf16>
    %c0_21 = arith.constant 0 : index
    %c0_22 = arith.constant 0 : index
    %c32_23 = arith.constant 32 : index
    %c0_24 = arith.constant 0 : index
    %21 = vector.load %arg3[%c0_21, %c0_22, %c32_23, %c0_24] : memref<1x12x33x8xbf16, #tpu.memory_space<vmem>>, vector<1x1x1x8xbf16>
    %22 = vector.shape_cast %21 : vector<1x1x1x8xbf16> to vector<1x8xbf16>
    %cst = arith.constant dense<0.000000e+00> : vector<8x8xf32>
    %23 = tpu.matmul %4, %20, %cst {dimension_numbers = #tpu.dot_dimension_numbers<[1], [0], [0], [1], [0, 0, 1, 1], [], []>} : vector<8x32xbf16>, vector<32x8xbf16>, vector<8x8xf32> -> vector<8x8xf32>
    %24 = arith.extf %22 : vector<1x8xbf16> to vector<1x8xf32>
    %25 = vector.broadcast %24 : vector<1x8xf32> to vector<8x8xf32>
    %26 = arith.addf %23, %25 : vector<8x8xf32>
    %c0_25 = arith.constant 0 : index
    %c4 = arith.constant 4 : index
    %c0_26 = arith.constant 0 : index
    %c0_27 = arith.constant 0 : index
    %27 = vector.load %arg3[%c0_25, %c4, %c0_26, %c0_27] : memref<1x12x33x8xbf16, #tpu.memory_space<vmem>>, vector<1x1x32x8xbf16>
    %28 = vector.shape_cast %27 : vector<1x1x32x8xbf16> to vector<32x8xbf16>
    %c0_28 = arith.constant 0 : index
    %c4_29 = arith.constant 4 : index
    %c32_30 = arith.constant 32 : index
    %c0_31 = arith.constant 0 : index
    %29 = vector.load %arg3[%c0_28, %c4_29, %c32_30, %c0_31] : memref<1x12x33x8xbf16, #tpu.memory_space<vmem>>, vector<1x1x1x8xbf16>
    %30 = vector.shape_cast %29 : vector<1x1x1x8xbf16> to vector<1x8xbf16>
    %cst_32 = arith.constant dense<0.000000e+00> : vector<8x8xf32>
    %31 = tpu.matmul %4, %28, %cst_32 {dimension_numbers = #tpu.dot_dimension_numbers<[1], [0], [0], [1], [0, 0, 1, 1], [], []>} : vector<8x32xbf16>, vector<32x8xbf16>, vector<8x8xf32> -> vector<8x8xf32>
    %32 = arith.extf %30 : vector<1x8xbf16> to vector<1x8xf32>
    %33 = vector.broadcast %32 : vector<1x8xf32> to vector<8x8xf32>
    %34 = arith.addf %31, %33 : vector<8x8xf32>
    %c0_33 = arith.constant 0 : index
    %c8 = arith.constant 8 : index
    %c0_34 = arith.constant 0 : index
    %c0_35 = arith.constant 0 : index
    %35 = vector.load %arg3[%c0_33, %c8, %c0_34, %c0_35] : memref<1x12x33x8xbf16, #tpu.memory_space<vmem>>, vector<1x1x32x8xbf16>
    %36 = vector.shape_cast %35 : vector<1x1x32x8xbf16> to vector<32x8xbf16>
    %c0_36 = arith.constant 0 : index
    %c8_37 = arith.constant 8 : index
    %c32_38 = arith.constant 32 : index
    %c0_39 = arith.constant 0 : index
    %37 = vector.load %arg3[%c0_36, %c8_37, %c32_38, %c0_39] : memref<1x12x33x8xbf16, #tpu.memory_space<vmem>>, vector<1x1x1x8xbf16>
    %38 = vector.shape_cast %37 : vector<1x1x1x8xbf16> to vector<1x8xbf16>
    %cst_40 = arith.constant dense<0.000000e+00> : vector<8x8xf32>
    %39 = tpu.matmul %4, %36, %cst_40 {dimension_numbers = #tpu.dot_dimension_numbers<[1], [0], [0], [1], [0, 0, 1, 1], [], []>} : vector<8x32xbf16>, vector<32x8xbf16>, vector<8x8xf32> -> vector<8x8xf32>
    %40 = arith.extf %38 : vector<1x8xbf16> to vector<1x8xf32>
    %41 = vector.broadcast %40 : vector<1x8xf32> to vector<8x8xf32>
    %42 = arith.addf %39, %41 : vector<8x8xf32>
    %43 = arith.truncf %26 : vector<8x8xf32> to vector<8x8xbf16>
    %44 = arith.truncf %34 : vector<8x8xf32> to vector<8x8xbf16>
    %cst_41 = arith.constant dense<0.000000e+00> : vector<8x8xf32>
    %45 = tpu.matmul %43, %44, %cst_41 {dimension_numbers = #tpu.dot_dimension_numbers<[1], [1], [0], [0], [0, 0, 1, 0], [], []>} : vector<8x8xbf16>, vector<8x8xbf16>, vector<8x8xf32> -> vector<8x8xf32>
    %cst_42 = arith.constant 0.353553385 : f32
    %46 = vector.broadcast %cst_42 : f32 to vector<8x8xf32>
    %47 = arith.mulf %45, %46 : vector<8x8xf32>
    %cst_43 = arith.constant dense<0xFF800000> : vector<8xf32>
    %48 = vector.multi_reduction <maximumf>, %47, %cst_43 [1] : vector<8x8xf32> to vector<8xf32>
    %49 = vector.shape_cast %48 : vector<8xf32> to vector<8x1xf32>
    %50 = vector.broadcast %49 : vector<8x1xf32> to vector<8x8xf32>
    %51 = arith.subf %47, %50 : vector<8x8xf32>
    %52 = math.exp %51 : vector<8x8xf32>
    %cst_44 = arith.constant dense<0.000000e+00> : vector<8xf32>
    %53 = vector.multi_reduction <add>, %52, %cst_44 [1] : vector<8x8xf32> to vector<8xf32>
    %54 = vector.shape_cast %53 : vector<8xf32> to vector<8x1xf32>
    %55 = tpu.reciprocal %54 {approx = true} : vector<8x1xf32> -> vector<8x1xf32>
    %56 = vector.broadcast %55 : vector<8x1xf32> to vector<8x8xf32>
    %57 = arith.mulf %52, %56 : vector<8x8xf32>
    %58 = arith.truncf %57 : vector<8x8xf32> to vector<8x8xbf16>
    %59 = arith.truncf %42 : vector<8x8xf32> to vector<8x8xbf16>
    %cst_45 = arith.constant dense<0.000000e+00> : vector<8x8xf32>
    %60 = tpu.matmul %58, %59, %cst_45 {dimension_numbers = #tpu.dot_dimension_numbers<[1], [0], [0], [1], [0, 0, 1, 1], [], []>} : vector<8x8xbf16>, vector<8x8xbf16>, vector<8x8xf32> -> vector<8x8xf32>
    %c0_46 = arith.constant 0 : index
    %c1 = arith.constant 1 : index
    %c0_47 = arith.constant 0 : index
    %c0_48 = arith.constant 0 : index
    %61 = vector.load %arg3[%c0_46, %c1, %c0_47, %c0_48] : memref<1x12x33x8xbf16, #tpu.memory_space<vmem>>, vector<1x1x32x8xbf16>
    %62 = vector.shape_cast %61 : vector<1x1x32x8xbf16> to vector<32x8xbf16>
    %c0_49 = arith.constant 0 : index
    %c1_50 = arith.constant 1 : index
    %c32_51 = arith.constant 32 : index
    %c0_52 = arith.constant 0 : index
    %63 = vector.load %arg3[%c0_49, %c1_50, %c32_51, %c0_52] : memref<1x12x33x8xbf16, #tpu.memory_space<vmem>>, vector<1x1x1x8xbf16>
    %64 = vector.shape_cast %63 : vector<1x1x1x8xbf16> to vector<1x8xbf16>
    %cst_53 = arith.constant dense<0.000000e+00> : vector<8x8xf32>
    %65 = tpu.matmul %4, %62, %cst_53 {dimension_numbers = #tpu.dot_dimension_numbers<[1], [0], [0], [1], [0, 0, 1, 1], [], []>} : vector<8x32xbf16>, vector<32x8xbf16>, vector<8x8xf32> -> vector<8x8xf32>
    %66 = arith.extf %64 : vector<1x8xbf16> to vector<1x8xf32>
    %67 = vector.broadcast %66 : vector<1x8xf32> to vector<8x8xf32>
    %68 = arith.addf %65, %67 : vector<8x8xf32>
    %c0_54 = arith.constant 0 : index
    %c5 = arith.constant 5 : index
    %c0_55 = arith.constant 0 : index
    %c0_56 = arith.constant 0 : index
    %69 = vector.load %arg3[%c0_54, %c5, %c0_55, %c0_56] : memref<1x12x33x8xbf16, #tpu.memory_space<vmem>>, vector<1x1x32x8xbf16>
    %70 = vector.shape_cast %69 : vector<1x1x32x8xbf16> to vector<32x8xbf16>
    %c0_57 = arith.constant 0 : index
    %c5_58 = arith.constant 5 : index
    %c32_59 = arith.constant 32 : index
    %c0_60 = arith.constant 0 : index
    %71 = vector.load %arg3[%c0_57, %c5_58, %c32_59, %c0_60] : memref<1x12x33x8xbf16, #tpu.memory_space<vmem>>, vector<1x1x1x8xbf16>
    %72 = vector.shape_cast %71 : vector<1x1x1x8xbf16> to vector<1x8xbf16>
    %cst_61 = arith.constant dense<0.000000e+00> : vector<8x8xf32>
    %73 = tpu.matmul %4, %70, %cst_61 {dimension_numbers = #tpu.dot_dimension_numbers<[1], [0], [0], [1], [0, 0, 1, 1], [], []>} : vector<8x32xbf16>, vector<32x8xbf16>, vector<8x8xf32> -> vector<8x8xf32>
    %74 = arith.extf %72 : vector<1x8xbf16> to vector<1x8xf32>
    %75 = vector.broadcast %74 : vector<1x8xf32> to vector<8x8xf32>
    %76 = arith.addf %73, %75 : vector<8x8xf32>
    %c0_62 = arith.constant 0 : index
    %c9 = arith.constant 9 : index
    %c0_63 = arith.constant 0 : index
    %c0_64 = arith.constant 0 : index
    %77 = vector.load %arg3[%c0_62, %c9, %c0_63, %c0_64] : memref<1x12x33x8xbf16, #tpu.memory_space<vmem>>, vector<1x1x32x8xbf16>
    %78 = vector.shape_cast %77 : vector<1x1x32x8xbf16> to vector<32x8xbf16>
    %c0_65 = arith.constant 0 : index
    %c9_66 = arith.constant 9 : index
    %c32_67 = arith.constant 32 : index
    %c0_68 = arith.constant 0 : index
    %79 = vector.load %arg3[%c0_65, %c9_66, %c32_67, %c0_68] : memref<1x12x33x8xbf16, #tpu.memory_space<vmem>>, vector<1x1x1x8xbf16>
    %80 = vector.shape_cast %79 : vector<1x1x1x8xbf16> to vector<1x8xbf16>
    %cst_69 = arith.constant dense<0.000000e+00> : vector<8x8xf32>
    %81 = tpu.matmul %4, %78, %cst_69 {dimension_numbers = #tpu.dot_dimension_numbers<[1], [0], [0], [1], [0, 0, 1, 1], [], []>} : vector<8x32xbf16>, vector<32x8xbf16>, vector<8x8xf32> -> vector<8x8xf32>
    %82 = arith.extf %80 : vector<1x8xbf16> to vector<1x8xf32>
    %83 = vector.broadcast %82 : vector<1x8xf32> to vector<8x8xf32>
    %84 = arith.addf %81, %83 : vector<8x8xf32>
    %85 = arith.truncf %68 : vector<8x8xf32> to vector<8x8xbf16>
    %86 = arith.truncf %76 : vector<8x8xf32> to vector<8x8xbf16>
    %cst_70 = arith.constant dense<0.000000e+00> : vector<8x8xf32>
    %87 = tpu.matmul %85, %86, %cst_70 {dimension_numbers = #tpu.dot_dimension_numbers<[1], [1], [0], [0], [0, 0, 1, 0], [], []>} : vector<8x8xbf16>, vector<8x8xbf16>, vector<8x8xf32> -> vector<8x8xf32>
    %cst_71 = arith.constant 0.353553385 : f32
    %88 = vector.broadcast %cst_71 : f32 to vector<8x8xf32>
    %89 = arith.mulf %87, %88 : vector<8x8xf32>
    %cst_72 = arith.constant dense<0xFF800000> : vector<8xf32>
    %90 = vector.multi_reduction <maximumf>, %89, %cst_72 [1] : vector<8x8xf32> to vector<8xf32>
    %91 = vector.shape_cast %90 : vector<8xf32> to vector<8x1xf32>
    %92 = vector.broadcast %91 : vector<8x1xf32> to vector<8x8xf32>
    %93 = arith.subf %89, %92 : vector<8x8xf32>
    %94 = math.exp %93 : vector<8x8xf32>
    %cst_73 = arith.constant dense<0.000000e+00> : vector<8xf32>
    %95 = vector.multi_reduction <add>, %94, %cst_73 [1] : vector<8x8xf32> to vector<8xf32>
    %96 = vector.shape_cast %95 : vector<8xf32> to vector<8x1xf32>
    %97 = tpu.reciprocal %96 {approx = true} : vector<8x1xf32> -> vector<8x1xf32>
    %98 = vector.broadcast %97 : vector<8x1xf32> to vector<8x8xf32>
    %99 = arith.mulf %94, %98 : vector<8x8xf32>
    %100 = arith.truncf %99 : vector<8x8xf32> to vector<8x8xbf16>
    %101 = arith.truncf %84 : vector<8x8xf32> to vector<8x8xbf16>
    %cst_74 = arith.constant dense<0.000000e+00> : vector<8x8xf32>
    %102 = tpu.matmul %100, %101, %cst_74 {dimension_numbers = #tpu.dot_dimension_numbers<[1], [0], [0], [1], [0, 0, 1, 1], [], []>} : vector<8x8xbf16>, vector<8x8xbf16>, vector<8x8xf32> -> vector<8x8xf32>
    %c0_75 = arith.constant 0 : index
    %c2 = arith.constant 2 : index
    %c0_76 = arith.constant 0 : index
    %c0_77 = arith.constant 0 : index
    %103 = vector.load %arg3[%c0_75, %c2, %c0_76, %c0_77] : memref<1x12x33x8xbf16, #tpu.memory_space<vmem>>, vector<1x1x32x8xbf16>
    %104 = vector.shape_cast %103 : vector<1x1x32x8xbf16> to vector<32x8xbf16>
    %c0_78 = arith.constant 0 : index
    %c2_79 = arith.constant 2 : index
    %c32_80 = arith.constant 32 : index
    %c0_81 = arith.constant 0 : index
    %105 = vector.load %arg3[%c0_78, %c2_79, %c32_80, %c0_81] : memref<1x12x33x8xbf16, #tpu.memory_space<vmem>>, vector<1x1x1x8xbf16>
    %106 = vector.shape_cast %105 : vector<1x1x1x8xbf16> to vector<1x8xbf16>
    %cst_82 = arith.constant dense<0.000000e+00> : vector<8x8xf32>
    %107 = tpu.matmul %4, %104, %cst_82 {dimension_numbers = #tpu.dot_dimension_numbers<[1], [0], [0], [1], [0, 0, 1, 1], [], []>} : vector<8x32xbf16>, vector<32x8xbf16>, vector<8x8xf32> -> vector<8x8xf32>
    %108 = arith.extf %106 : vector<1x8xbf16> to vector<1x8xf32>
    %109 = vector.broadcast %108 : vector<1x8xf32> to vector<8x8xf32>
    %110 = arith.addf %107, %109 : vector<8x8xf32>
    %c0_83 = arith.constant 0 : index
    %c6 = arith.constant 6 : index
    %c0_84 = arith.constant 0 : index
    %c0_85 = arith.constant 0 : index
    %111 = vector.load %arg3[%c0_83, %c6, %c0_84, %c0_85] : memref<1x12x33x8xbf16, #tpu.memory_space<vmem>>, vector<1x1x32x8xbf16>
    %112 = vector.shape_cast %111 : vector<1x1x32x8xbf16> to vector<32x8xbf16>
    %c0_86 = arith.constant 0 : index
    %c6_87 = arith.constant 6 : index
    %c32_88 = arith.constant 32 : index
    %c0_89 = arith.constant 0 : index
    %113 = vector.load %arg3[%c0_86, %c6_87, %c32_88, %c0_89] : memref<1x12x33x8xbf16, #tpu.memory_space<vmem>>, vector<1x1x1x8xbf16>
    %114 = vector.shape_cast %113 : vector<1x1x1x8xbf16> to vector<1x8xbf16>
    %cst_90 = arith.constant dense<0.000000e+00> : vector<8x8xf32>
    %115 = tpu.matmul %4, %112, %cst_90 {dimension_numbers = #tpu.dot_dimension_numbers<[1], [0], [0], [1], [0, 0, 1, 1], [], []>} : vector<8x32xbf16>, vector<32x8xbf16>, vector<8x8xf32> -> vector<8x8xf32>
    %116 = arith.extf %114 : vector<1x8xbf16> to vector<1x8xf32>
    %117 = vector.broadcast %116 : vector<1x8xf32> to vector<8x8xf32>
    %118 = arith.addf %115, %117 : vector<8x8xf32>
    %c0_91 = arith.constant 0 : index
    %c10 = arith.constant 10 : index
    %c0_92 = arith.constant 0 : index
    %c0_93 = arith.constant 0 : index
    %119 = vector.load %arg3[%c0_91, %c10, %c0_92, %c0_93] : memref<1x12x33x8xbf16, #tpu.memory_space<vmem>>, vector<1x1x32x8xbf16>
    %120 = vector.shape_cast %119 : vector<1x1x32x8xbf16> to vector<32x8xbf16>
    %c0_94 = arith.constant 0 : index
    %c10_95 = arith.constant 10 : index
    %c32_96 = arith.constant 32 : index
    %c0_97 = arith.constant 0 : index
    %121 = vector.load %arg3[%c0_94, %c10_95, %c32_96, %c0_97] : memref<1x12x33x8xbf16, #tpu.memory_space<vmem>>, vector<1x1x1x8xbf16>
    %122 = vector.shape_cast %121 : vector<1x1x1x8xbf16> to vector<1x8xbf16>
    %cst_98 = arith.constant dense<0.000000e+00> : vector<8x8xf32>
    %123 = tpu.matmul %4, %120, %cst_98 {dimension_numbers = #tpu.dot_dimension_numbers<[1], [0], [0], [1], [0, 0, 1, 1], [], []>} : vector<8x32xbf16>, vector<32x8xbf16>, vector<8x8xf32> -> vector<8x8xf32>
    %124 = arith.extf %122 : vector<1x8xbf16> to vector<1x8xf32>
    %125 = vector.broadcast %124 : vector<1x8xf32> to vector<8x8xf32>
    %126 = arith.addf %123, %125 : vector<8x8xf32>
    %127 = arith.truncf %110 : vector<8x8xf32> to vector<8x8xbf16>
    %128 = arith.truncf %118 : vector<8x8xf32> to vector<8x8xbf16>
    %cst_99 = arith.constant dense<0.000000e+00> : vector<8x8xf32>
    %129 = tpu.matmul %127, %128, %cst_99 {dimension_numbers = #tpu.dot_dimension_numbers<[1], [1], [0], [0], [0, 0, 1, 0], [], []>} : vector<8x8xbf16>, vector<8x8xbf16>, vector<8x8xf32> -> vector<8x8xf32>
    %cst_100 = arith.constant 0.353553385 : f32
    %130 = vector.broadcast %cst_100 : f32 to vector<8x8xf32>
    %131 = arith.mulf %129, %130 : vector<8x8xf32>
    %cst_101 = arith.constant dense<0xFF800000> : vector<8xf32>
    %132 = vector.multi_reduction <maximumf>, %131, %cst_101 [1] : vector<8x8xf32> to vector<8xf32>
    %133 = vector.shape_cast %132 : vector<8xf32> to vector<8x1xf32>
    %134 = vector.broadcast %133 : vector<8x1xf32> to vector<8x8xf32>
    %135 = arith.subf %131, %134 : vector<8x8xf32>
    %136 = math.exp %135 : vector<8x8xf32>
    %cst_102 = arith.constant dense<0.000000e+00> : vector<8xf32>
    %137 = vector.multi_reduction <add>, %136, %cst_102 [1] : vector<8x8xf32> to vector<8xf32>
    %138 = vector.shape_cast %137 : vector<8xf32> to vector<8x1xf32>
    %139 = tpu.reciprocal %138 {approx = true} : vector<8x1xf32> -> vector<8x1xf32>
    %140 = vector.broadcast %139 : vector<8x1xf32> to vector<8x8xf32>
    %141 = arith.mulf %136, %140 : vector<8x8xf32>
    %142 = arith.truncf %141 : vector<8x8xf32> to vector<8x8xbf16>
    %143 = arith.truncf %126 : vector<8x8xf32> to vector<8x8xbf16>
    %cst_103 = arith.constant dense<0.000000e+00> : vector<8x8xf32>
    %144 = tpu.matmul %142, %143, %cst_103 {dimension_numbers = #tpu.dot_dimension_numbers<[1], [0], [0], [1], [0, 0, 1, 1], [], []>} : vector<8x8xbf16>, vector<8x8xbf16>, vector<8x8xf32> -> vector<8x8xf32>
    %c0_104 = arith.constant 0 : index
    %c3 = arith.constant 3 : index
    %c0_105 = arith.constant 0 : index
    %c0_106 = arith.constant 0 : index
    %145 = vector.load %arg3[%c0_104, %c3, %c0_105, %c0_106] : memref<1x12x33x8xbf16, #tpu.memory_space<vmem>>, vector<1x1x32x8xbf16>
    %146 = vector.shape_cast %145 : vector<1x1x32x8xbf16> to vector<32x8xbf16>
    %c0_107 = arith.constant 0 : index
    %c3_108 = arith.constant 3 : index
    %c32_109 = arith.constant 32 : index
    %c0_110 = arith.constant 0 : index
    %147 = vector.load %arg3[%c0_107, %c3_108, %c32_109, %c0_110] : memref<1x12x33x8xbf16, #tpu.memory_space<vmem>>, vector<1x1x1x8xbf16>
    %148 = vector.shape_cast %147 : vector<1x1x1x8xbf16> to vector<1x8xbf16>
    %cst_111 = arith.constant dense<0.000000e+00> : vector<8x8xf32>
    %149 = tpu.matmul %4, %146, %cst_111 {dimension_numbers = #tpu.dot_dimension_numbers<[1], [0], [0], [1], [0, 0, 1, 1], [], []>} : vector<8x32xbf16>, vector<32x8xbf16>, vector<8x8xf32> -> vector<8x8xf32>
    %150 = arith.extf %148 : vector<1x8xbf16> to vector<1x8xf32>
    %151 = vector.broadcast %150 : vector<1x8xf32> to vector<8x8xf32>
    %152 = arith.addf %149, %151 : vector<8x8xf32>
    %c0_112 = arith.constant 0 : index
    %c7 = arith.constant 7 : index
    %c0_113 = arith.constant 0 : index
    %c0_114 = arith.constant 0 : index
    %153 = vector.load %arg3[%c0_112, %c7, %c0_113, %c0_114] : memref<1x12x33x8xbf16, #tpu.memory_space<vmem>>, vector<1x1x32x8xbf16>
    %154 = vector.shape_cast %153 : vector<1x1x32x8xbf16> to vector<32x8xbf16>
    %c0_115 = arith.constant 0 : index
    %c7_116 = arith.constant 7 : index
    %c32_117 = arith.constant 32 : index
    %c0_118 = arith.constant 0 : index
    %155 = vector.load %arg3[%c0_115, %c7_116, %c32_117, %c0_118] : memref<1x12x33x8xbf16, #tpu.memory_space<vmem>>, vector<1x1x1x8xbf16>
    %156 = vector.shape_cast %155 : vector<1x1x1x8xbf16> to vector<1x8xbf16>
    %cst_119 = arith.constant dense<0.000000e+00> : vector<8x8xf32>
    %157 = tpu.matmul %4, %154, %cst_119 {dimension_numbers = #tpu.dot_dimension_numbers<[1], [0], [0], [1], [0, 0, 1, 1], [], []>} : vector<8x32xbf16>, vector<32x8xbf16>, vector<8x8xf32> -> vector<8x8xf32>
    %158 = arith.extf %156 : vector<1x8xbf16> to vector<1x8xf32>
    %159 = vector.broadcast %158 : vector<1x8xf32> to vector<8x8xf32>
    %160 = arith.addf %157, %159 : vector<8x8xf32>
    %c0_120 = arith.constant 0 : index
    %c11 = arith.constant 11 : index
    %c0_121 = arith.constant 0 : index
    %c0_122 = arith.constant 0 : index
    %161 = vector.load %arg3[%c0_120, %c11, %c0_121, %c0_122] : memref<1x12x33x8xbf16, #tpu.memory_space<vmem>>, vector<1x1x32x8xbf16>
    %162 = vector.shape_cast %161 : vector<1x1x32x8xbf16> to vector<32x8xbf16>
    %c0_123 = arith.constant 0 : index
    %c11_124 = arith.constant 11 : index
    %c32_125 = arith.constant 32 : index
    %c0_126 = arith.constant 0 : index
    %163 = vector.load %arg3[%c0_123, %c11_124, %c32_125, %c0_126] : memref<1x12x33x8xbf16, #tpu.memory_space<vmem>>, vector<1x1x1x8xbf16>
    %164 = vector.shape_cast %163 : vector<1x1x1x8xbf16> to vector<1x8xbf16>
    %cst_127 = arith.constant dense<0.000000e+00> : vector<8x8xf32>
    %165 = tpu.matmul %4, %162, %cst_127 {dimension_numbers = #tpu.dot_dimension_numbers<[1], [0], [0], [1], [0, 0, 1, 1], [], []>} : vector<8x32xbf16>, vector<32x8xbf16>, vector<8x8xf32> -> vector<8x8xf32>
    %166 = arith.extf %164 : vector<1x8xbf16> to vector<1x8xf32>
    %167 = vector.broadcast %166 : vector<1x8xf32> to vector<8x8xf32>
    %168 = arith.addf %165, %167 : vector<8x8xf32>
    %169 = arith.truncf %152 : vector<8x8xf32> to vector<8x8xbf16>
    %170 = arith.truncf %160 : vector<8x8xf32> to vector<8x8xbf16>
    %cst_128 = arith.constant dense<0.000000e+00> : vector<8x8xf32>
    %171 = tpu.matmul %169, %170, %cst_128 {dimension_numbers = #tpu.dot_dimension_numbers<[1], [1], [0], [0], [0, 0, 1, 0], [], []>} : vector<8x8xbf16>, vector<8x8xbf16>, vector<8x8xf32> -> vector<8x8xf32>
    %cst_129 = arith.constant 0.353553385 : f32
    %172 = vector.broadcast %cst_129 : f32 to vector<8x8xf32>
    %173 = arith.mulf %171, %172 : vector<8x8xf32>
    %cst_130 = arith.constant dense<0xFF800000> : vector<8xf32>
    %174 = vector.multi_reduction <maximumf>, %173, %cst_130 [1] : vector<8x8xf32> to vector<8xf32>
    %175 = vector.shape_cast %174 : vector<8xf32> to vector<8x1xf32>
    %176 = vector.broadcast %175 : vector<8x1xf32> to vector<8x8xf32>
    %177 = arith.subf %173, %176 : vector<8x8xf32>
    %178 = math.exp %177 : vector<8x8xf32>
    %cst_131 = arith.constant dense<0.000000e+00> : vector<8xf32>
    %179 = vector.multi_reduction <add>, %178, %cst_131 [1] : vector<8x8xf32> to vector<8xf32>
    %180 = vector.shape_cast %179 : vector<8xf32> to vector<8x1xf32>
    %181 = tpu.reciprocal %180 {approx = true} : vector<8x1xf32> -> vector<8x1xf32>
    %182 = vector.broadcast %181 : vector<8x1xf32> to vector<8x8xf32>
    %183 = arith.mulf %178, %182 : vector<8x8xf32>
    %184 = arith.truncf %183 : vector<8x8xf32> to vector<8x8xbf16>
    %185 = arith.truncf %168 : vector<8x8xf32> to vector<8x8xbf16>
    %cst_132 = arith.constant dense<0.000000e+00> : vector<8x8xf32>
    %186 = tpu.matmul %184, %185, %cst_132 {dimension_numbers = #tpu.dot_dimension_numbers<[1], [0], [0], [1], [0, 0, 1, 1], [], []>} : vector<8x8xbf16>, vector<8x8xbf16>, vector<8x8xf32> -> vector<8x8xf32>
    %187 = tpu.concatenate %60, %102, %144, %186 in 1 : vector<8x8xf32>, vector<8x8xf32>, vector<8x8xf32>, vector<8x8xf32> -> vector<8x32xf32>
    %c0_133 = arith.constant 0 : index
    %c0_134 = arith.constant 0 : index
    %c0_135 = arith.constant 0 : index
    %c0_136 = arith.constant 0 : index
    %188 = vector.load %arg4[%c0_133, %c0_134, %c0_135, %c0_136] : memref<1x3x32x64xbf16, #tpu.memory_space<vmem>>, vector<1x1x32x32xbf16>
    %189 = vector.shape_cast %188 : vector<1x1x32x32xbf16> to vector<32x32xbf16>
    %190 = arith.truncf %187 : vector<8x32xf32> to vector<8x32xbf16>
    %cst_137 = arith.constant dense<0.000000e+00> : vector<8x32xf32>
    %191 = tpu.matmul %190, %189, %cst_137 {dimension_numbers = #tpu.dot_dimension_numbers<[1], [0], [0], [1], [0, 0, 1, 1], [], []>} : vector<8x32xbf16>, vector<32x32xbf16>, vector<8x32xf32> -> vector<8x32xf32>
    %192 = vector.broadcast %6 : vector<1x32xf32> to vector<8x32xf32>
    %193 = arith.addf %191, %192 : vector<8x32xf32>
    %194 = arith.addf %3, %193 : vector<8x32xf32>
    %cst_138 = arith.constant dense<0.000000e+00> : vector<8xf32>
    %195 = vector.multi_reduction <add>, %194, %cst_138 [1] : vector<8x32xf32> to vector<8xf32>
    %196 = vector.shape_cast %195 : vector<8xf32> to vector<8x1xf32>
    %cst_139 = arith.constant 3.200000e+01 : f32
    %197 = vector.broadcast %cst_139 : f32 to vector<8x1xf32>
    %198 = arith.divf %196, %197 : vector<8x1xf32>
    %199 = vector.broadcast %198 : vector<8x1xf32> to vector<8x32xf32>
    %200 = arith.subf %194, %199 : vector<8x32xf32>
    %201 = arith.mulf %200, %200 : vector<8x32xf32>
    %cst_140 = arith.constant dense<0.000000e+00> : vector<8xf32>
    %202 = vector.multi_reduction <add>, %201, %cst_140 [1] : vector<8x32xf32> to vector<8xf32>
    %203 = vector.shape_cast %202 : vector<8xf32> to vector<8x1xf32>
    %cst_141 = arith.constant 3.200000e+01 : f32
    %204 = vector.broadcast %cst_141 : f32 to vector<8x1xf32>
    %205 = arith.divf %203, %204 : vector<8x1xf32>
    %206 = vector.broadcast %198 : vector<8x1xf32> to vector<8x32xf32>
    %207 = arith.subf %194, %206 : vector<8x32xf32>
    %cst_142 = arith.constant 9.99999974E-6 : f32
    %208 = vector.broadcast %cst_142 : f32 to vector<8x1xf32>
    %209 = arith.addf %205, %208 : vector<8x1xf32>
    %210 = math.rsqrt %209 : vector<8x1xf32>
    %211 = vector.broadcast %210 : vector<8x1xf32> to vector<8x32xf32>
    %212 = arith.mulf %207, %211 : vector<8x32xf32>
    %213 = vector.broadcast %12 : vector<1x32xf32> to vector<8x32xf32>
    %214 = arith.mulf %212, %213 : vector<8x32xf32>
    %215 = vector.broadcast %14 : vector<1x32xf32> to vector<8x32xf32>
    %216 = arith.addf %214, %215 : vector<8x32xf32>
    %c0_143 = arith.constant 0 : index
    %c1_144 = arith.constant 1 : index
    %c0_145 = arith.constant 0 : index
    %c0_146 = arith.constant 0 : index
    %217 = vector.load %arg4[%c0_143, %c1_144, %c0_145, %c0_146] : memref<1x3x32x64xbf16, #tpu.memory_space<vmem>>, vector<1x1x32x64xbf16>
    %218 = vector.shape_cast %217 : vector<1x1x32x64xbf16> to vector<32x64xbf16>
    %219 = arith.truncf %216 : vector<8x32xf32> to vector<8x32xbf16>
    %cst_147 = arith.constant dense<0.000000e+00> : vector<8x64xf32>
    %220 = tpu.matmul %219, %218, %cst_147 {dimension_numbers = #tpu.dot_dimension_numbers<[1], [0], [0], [1], [0, 0, 1, 1], [], []>} : vector<8x32xbf16>, vector<32x64xbf16>, vector<8x64xf32> -> vector<8x64xf32>
    %221 = vector.broadcast %8 : vector<1x64xf32> to vector<8x64xf32>
    %222 = arith.addf %220, %221 : vector<8x64xf32>
    %cst_148 = arith.constant 0.000000e+00 : f32
    %223 = vector.broadcast %cst_148 : f32 to vector<8x64xf32>
    %224 = arith.maximumf %222, %223 : vector<8x64xf32>
    %c0_149 = arith.constant 0 : index
    %c2_150 = arith.constant 2 : index
    %c0_151 = arith.constant 0 : index
    %c0_152 = arith.constant 0 : index
    %225 = vector.load %arg4[%c0_149, %c2_150, %c0_151, %c0_152] : memref<1x3x32x64xbf16, #tpu.memory_space<vmem>>, vector<1x1x32x64xbf16>
    %226 = vector.shape_cast %225 : vector<1x1x32x64xbf16> to vector<32x64xbf16>
    %227 = arith.truncf %224 : vector<8x64xf32> to vector<8x64xbf16>
    %cst_153 = arith.constant dense<0.000000e+00> : vector<8x32xf32>
    %228 = tpu.matmul %227, %226, %cst_153 {dimension_numbers = #tpu.dot_dimension_numbers<[1], [1], [0], [0], [0, 0, 1, 0], [], []>} : vector<8x64xbf16>, vector<32x64xbf16>, vector<8x32xf32> -> vector<8x32xf32>
    %229 = vector.broadcast %10 : vector<1x32xf32> to vector<8x32xf32>
    %230 = arith.addf %228, %229 : vector<8x32xf32>
    %231 = arith.addf %216, %230 : vector<8x32xf32>
    %cst_154 = arith.constant dense<0.000000e+00> : vector<8xf32>
    %232 = vector.multi_reduction <add>, %231, %cst_154 [1] : vector<8x32xf32> to vector<8xf32>
    %233 = vector.shape_cast %232 : vector<8xf32> to vector<8x1xf32>
    %cst_155 = arith.constant 3.200000e+01 : f32
    %234 = vector.broadcast %cst_155 : f32 to vector<8x1xf32>
    %235 = arith.divf %233, %234 : vector<8x1xf32>
    %236 = vector.broadcast %235 : vector<8x1xf32> to vector<8x32xf32>
    %237 = arith.subf %231, %236 : vector<8x32xf32>
    %238 = arith.mulf %237, %237 : vector<8x32xf32>
    %cst_156 = arith.constant dense<0.000000e+00> : vector<8xf32>
    %239 = vector.multi_reduction <add>, %238, %cst_156 [1] : vector<8x32xf32> to vector<8xf32>
    %240 = vector.shape_cast %239 : vector<8xf32> to vector<8x1xf32>
    %cst_157 = arith.constant 3.200000e+01 : f32
    %241 = vector.broadcast %cst_157 : f32 to vector<8x1xf32>
    %242 = arith.divf %240, %241 : vector<8x1xf32>
    %243 = vector.broadcast %235 : vector<8x1xf32> to vector<8x32xf32>
    %244 = arith.subf %231, %243 : vector<8x32xf32>
    %cst_158 = arith.constant 9.99999974E-6 : f32
    %245 = vector.broadcast %cst_158 : f32 to vector<8x1xf32>
    %246 = arith.addf %242, %245 : vector<8x1xf32>
    %247 = math.rsqrt %246 : vector<8x1xf32>
    %248 = vector.broadcast %247 : vector<8x1xf32> to vector<8x32xf32>
    %249 = arith.mulf %244, %248 : vector<8x32xf32>
    %250 = vector.broadcast %16 : vector<1x32xf32> to vector<8x32xf32>
    %251 = arith.mulf %249, %250 : vector<8x32xf32>
    %252 = vector.broadcast %18 : vector<1x32xf32> to vector<8x32xf32>
    %253 = arith.addf %251, %252 : vector<8x32xf32>
    %c0_159 = arith.constant 0 : index
    %c0_160 = arith.constant 0 : index
    %254 = vector.load %arg8[%c0_159, %c0_160] : memref<8x32xf32, #tpu.memory_space<vmem>>, vector<8x32xf32>
    tpu.vector_store %arg8[%c0_159, %c0_160], %253 {strides = array<i32>} : memref<8x32xf32, #tpu.memory_space<vmem>>, vector<8x32xf32>,
    %c1_i32 = arith.constant 1 : i32
    %255 = arith.cmpi eq, %arg1, %c1_i32 : i32
    %256 = arith.extui %255 : i1 to i32
    %c0_i32_161 = arith.constant 0 : i32
    %257 = arith.cmpi ne, %256, %c0_i32_161 : i32
    scf.if %257 {
      %c0_162 = arith.constant 0 : index
      %c0_163 = arith.constant 0 : index
      %258 = vector.load %arg6[%c0_162, %c0_163] : memref<1x64xf32, #tpu.memory_space<vmem>>, vector<1x32xf32>
      %c0_164 = arith.constant 0 : index
      %c32_165 = arith.constant 32 : index
      %259 = vector.load %arg6[%c0_164, %c32_165] : memref<1x64xf32, #tpu.memory_space<vmem>>, vector<1x32xf32>
      %cst_166 = arith.constant dense<0.000000e+00> : vector<8xf32>
      %260 = vector.multi_reduction <add>, %253, %cst_166 [1] : vector<8x32xf32> to vector<8xf32>
      %261 = vector.shape_cast %260 : vector<8xf32> to vector<8x1xf32>
      %cst_167 = arith.constant 3.200000e+01 : f32
      %262 = vector.broadcast %cst_167 : f32 to vector<8x1xf32>
      %263 = arith.divf %261, %262 : vector<8x1xf32>
      %264 = vector.broadcast %263 : vector<8x1xf32> to vector<8x32xf32>
      %265 = arith.subf %253, %264 : vector<8x32xf32>
      %266 = arith.mulf %265, %265 : vector<8x32xf32>
      %cst_168 = arith.constant dense<0.000000e+00> : vector<8xf32>
      %267 = vector.multi_reduction <add>, %266, %cst_168 [1] : vector<8x32xf32> to vector<8xf32>
      %268 = vector.shape_cast %267 : vector<8xf32> to vector<8x1xf32>
      %cst_169 = arith.constant 3.200000e+01 : f32
      %269 = vector.broadcast %cst_169 : f32 to vector<8x1xf32>
      %270 = arith.divf %268, %269 : vector<8x1xf32>
      %271 = vector.broadcast %263 : vector<8x1xf32> to vector<8x32xf32>
      %272 = arith.subf %253, %271 : vector<8x32xf32>
      %cst_170 = arith.constant 9.99999974E-6 : f32
      %273 = vector.broadcast %cst_170 : f32 to vector<8x1xf32>
      %274 = arith.addf %270, %273 : vector<8x1xf32>
      %275 = math.rsqrt %274 : vector<8x1xf32>
      %276 = vector.broadcast %275 : vector<8x1xf32> to vector<8x32xf32>
      %277 = arith.mulf %272, %276 : vector<8x32xf32>
      %278 = vector.broadcast %258 : vector<1x32xf32> to vector<8x32xf32>
      %279 = arith.mulf %277, %278 : vector<8x32xf32>
      %280 = vector.broadcast %259 : vector<1x32xf32> to vector<8x32xf32>
      %281 = arith.addf %279, %280 : vector<8x32xf32>
      %c0_171 = arith.constant 0 : index
      %c0_172 = arith.constant 0 : index
      %c0_173 = arith.constant 0 : index
      %282 = vector.load %arg7[%c0_171, %c0_172, %c0_173] : memref<1x8x32xf32, #tpu.memory_space<vmem>>, vector<1x8x32xf32>
      %283 = vector.shape_cast %282 : vector<1x8x32xf32> to vector<8x32xf32>
      %284 = vector.shape_cast %281 : vector<8x32xf32> to vector<1x8x32xf32>
      tpu.vector_store %arg7[%c0_171, %c0_172, %c0_173], %284 {strides = array<i32>} : memref<1x8x32xf32, #tpu.memory_space<vmem>>, vector<1x8x32xf32>,
    } else {
    }
    return
  }
  func.func @transform_0(%arg0: i32, %arg1: i32) -> (i32, i32, i32) {
    %c0_i32 = arith.constant 0 : i32
    %c0_i32_0 = arith.constant 0 : i32
    %c0_i32_1 = arith.constant 0 : i32
    return %arg0, %c0_i32, %c0_i32_0 : i32, i32, i32
  }
  func.func @transform_1(%arg0: i32, %arg1: i32) -> (i32, i32, i32, i32) {
    %c0_i32 = arith.constant 0 : i32
    %c0_i32_0 = arith.constant 0 : i32
    %c0_i32_1 = arith.constant 0 : i32
    %c0_i32_2 = arith.constant 0 : i32
    return %arg1, %c0_i32, %c0_i32_0, %c0_i32_1 : i32, i32, i32, i32
  }
  func.func @transform_2(%arg0: i32, %arg1: i32) -> (i32, i32, i32, i32) {
    %c0_i32 = arith.constant 0 : i32
    %c0_i32_0 = arith.constant 0 : i32
    %c0_i32_1 = arith.constant 0 : i32
    %c0_i32_2 = arith.constant 0 : i32
    return %arg1, %c0_i32, %c0_i32_0, %c0_i32_1 : i32, i32, i32, i32
  }
  func.func @transform_3(%arg0: i32, %arg1: i32) -> (i32, i32, i32) {
    %c0_i32 = arith.constant 0 : i32
    %c0_i32_0 = arith.constant 0 : i32
    %c0_i32_1 = arith.constant 0 : i32
    return %arg1, %c0_i32, %c0_i32_0 : i32, i32, i32
  }
  func.func @transform_4(%arg0: i32, %arg1: i32) -> (i32, i32) {
    %c0_i32 = arith.constant 0 : i32
    %c0_i32_0 = arith.constant 0 : i32
    %c0_i32_1 = arith.constant 0 : i32
    return %c0_i32, %c0_i32_0 : i32, i32
  }
  func.func @transform_5(%arg0: i32, %arg1: i32) -> (i32, i32, i32) {
    %c0_i32 = arith.constant 0 : i32
    %c0_i32_0 = arith.constant 0 : i32
    %c0_i32_1 = arith.constant 0 : i32
    return %arg0, %c0_i32, %c0_i32_0 : i32, i32, i32
  }
}

</mosaic_0001>

<bundles_post_ra>
// kernel: tpu_custom_call.1
= control target key start
LH: loop header
LB: loop body
LE: loop exit
PB: predicated region body
PF: predicated region fallthrough
CT: control target
= control target key end

     0   :  { %10 = vsyncpa [#allocation4], 0  ;;  %s2920_s0 = inlined_call_operand.vmem [shape: f32[2,8,32], index: 0, kind: input, shape index: {}]   ;;  %s2921_s1 = inlined_call_operand.vmem [shape: bf16[2,12,33,8], index: 1, kind: input, shape index: {}]   ;;  %s2922_s2 = inlined_call_operand.vmem [shape: bf16[2,3,32,64], index: 2, kind: input, shape index: {}]   ;;  %s2923_s3 = inlined_call_operand.vmem [shape: f32[2,1,256], index: 3, kind: input, shape index: {}]   ;;  %s2924_s4 = inlined_call_operand.vmem [shape: f32[1,64], index: 4, kind: input, shape index: {}]   ;;  %s2925_s5 = inlined_call_operand.hbm [shape: f32[2,8,32], index: 5, kind: output, shape index: {}]  }
   0x1   :  { %12 = vsyncpa [#allocation4 + $0x1], 0  ;;  %s2544_s18 = smov 0   ;;  %s2546_s19 = smov 0  }
   0x2   :  { %s2548_s20 = smov 0   ;;  %s2550_s21 = smov 0  }
   0x3   :  { %s2552_s22 = smov 0   ;;  %s2554_s23 = smov 0  }
   0x4   :  { %s2556_s24 = smov 0   ;;  %s2558_s25 = smov 0  }
   0x5 LB: > { %2931 = sst [smem:[#allocation6_spill]] %s2482_s20  ;;  %s1910_s26 = sadd.s32 4294967295, %s2502_s25   ;;  %s2502_s25 = sphi %s2558_s25, %s18_s25   ;;  %s2498_s24 = sphi %s2556_s24, %s2945_s24   ;;  %s2494_s23 = sphi %s2554_s23, %s2944_s23   ;;  %s2490_s22 = sphi %s2552_s22, %s2943_s22   ;;  %s2486_s21 = sphi %s2550_s21, %s2942_s21   ;;  %s2482_s20 = sphi %s2548_s20, %s2941_s20   ;;  %s2478_s19 = sphi %s2546_s19, %s2947_s19   ;;  %s2474_s18 = sphi %s2544_s18, %s2946_s18  }
   0x6   : > { %2932 = sst [smem:[#allocation7_spill]] %s2494_s23  ;;  %s1911_s27 = sadd.s32 4294967294, %s2502_s25  }
   0x7   : > { %2933 = sst [smem:[#allocation8_spill]] %s2498_s24  ;;  %s27_s28 = sadd.s32 1, %s2494_s23 }
   0x8   : > { %p28_p0 = scmp.ge.s32.totalorder %s27_s28, 2  ;;  %s30_s29 = sadd.s32 1, %s2498_s24 }
   0x9   : > { %p172_p1 = scmp.ne.s32.totalorder %s2482_s20, %s2478_s19  ;;  %p173_p2 = scmp.eq.s32.totalorder %s1910_s26, 3 }
   0xa   : > { %s2949_s28 = smov (%p28_p0, %s27_s28), 0  ;;  %s2951_s29 = smov (!%p28_p0, %s30_s29), %s2498_s24 }
   0xb   : > { %2934 = sst [smem:[#allocation9_spill]] %s2949_s28  ;;  %p2593_p3 = por %p173_p2, %p172_p1 }
   0xc   : > { %p178_p4 = scmp.ne.s32.totalorder %s2478_s19, %s2474_s18  ;;  %p32_p5 = scmp.ge.s32.totalorder %s2951_s29, 2 }
   0xd   : > { %p179_p6 = scmp.eq.s32.totalorder %s1911_s27, 3  ;;  %p1914_p7 = scmp.ge.s32.totalorder %s2502_s25, 1 }
   0xe   : > { %p230_p8 = scmp.lt.s32.totalorder %s2502_s25, 5  ;;  %s2953_s29 = smov (%p32_p5, %s2951_s29), 0 }
   0xf   : > { %2936 = sst [smem:[#allocation10_spill]] %s2953_s29  ;;  %p2603_p9 = por %p179_p6, %p178_p4 }
  0x10   : > { %p231_p10 = pnand %p1914_p7, %p230_p8  ;;  %s159_s7 = ssub.s32 %s2498_s24, %s2953_s29 }
  0x11   : > { %s162_s8 = sadd.s32 1, %s2482_s20  ;;  %p160_p11 = scmp.eq.s32.totalorder %s159_s7, 0 }
  0x12   : > { %234 = sbr.rel (%p231_p10) target bundleno = 5038 (0x13ae), region = 40  ;;  %s2928_s10 = sand.u32 (!%p231_p10), 1, %s2478_s19  }
  0x13   : > { %s2611_s9 = scalar_select %p160_p11, %s2482_s20, %s162_s8  }
  0x14   : > { %p271_p12 = scmp.lt.s32.totalorder (!%p231_p10), %s2490_s22, 1  ;;  %s2617_s11 = sshll.u32 (!%p231_p10), %s2928_s10, 3 }
  0x15   : > { %2938 = sst [smem:[#allocation11_spill]] %s2611_s9  ;;  %p275_p13 = scmp.lt.s32.totalorder (!%p231_p10), %s2486_s21, 1 }
  0x16   : > { %s270_s15 = scalar_lea.vmem (!%p231_p10), [#allocation3], %s2617_s11  ;;  %p1920_p0 = scmp.ne.s32.totalorder (!%p231_p10), %s2486_s21, 0 }
  0x19   : > { %s272_s12 = scalar_select %p271_p12, %s2490_s22, 1 }
  0x1a   : > { %s276_s13 = scalar_select %p275_p13, %s2486_s21, 1 }
  0x1b   : > { %s1916_s14 = sshll.u32 %s272_s12, 3  ;;  %293 = sbr.rel (%p1920_p0) target bundleno = 34 (0x22), region = 44  ;;  %vm295_vm0 = vcmask (!%p1920_p0), 261120  }
  0x1c   : > { %s274_s17 = scalar_lea.vmem %s2920_s0, %s1916_s14  ;;  %s2274_s26 = smul.u32 240, %s276_s13 }
  0x1d   : > { %s2275_s27 = smul.u32 48, %s276_s13  ;;  %s1919_s7 = sshll.u32 %s276_s13, 1  ;;  %v294_v0 = vld [vmem:[%s274_s17] sm:$0xff] (!%p1920_p0) }
  0x1e   : > { %s2628_s28 = scalar_lea.vmem %s2921_s1, %s2274_s26  ;;  %s2633_s23 = scalar_lea.vmem %s2923_s3, %s1919_s7  ;;  %296 = vst.msk [vmem:[#allocation2] sm:$0xff] (!%p1920_p0), %vm295_vm0, %v294_v0 }
  0x1f   : > { %s2638_s12 = scalar_lea.vmem %s2922_s2, %s2275_s27 }
  0x22 PF: > { %v2356_v1 = vld [vmem:[%s2628_s28] sm:$0xff]   ;;  %v2504_v2 = vmov 0.0   ;;  %v2357_v3 = vld [vmem:[%s2628_s28 + $0x8] sm:$0xff]   ;;  %vm2505_vm1 = vmmov 0   ;;  %vm323_vm2 = vcmask 261120   ;;  %v2358_v6 = vld [vmem:[%s2628_s28 + $0x50] sm:$0xff]   ;;  %v307_v8 = vlaneseq }
  0x23   : > { %2106 = vmatprep.subr.bf16.mxu1 %v2504_v2  ;;  %2122 = vmatprep.subr.bf16.mxu0 %v2504_v2  ;;  %v2359_v7 = vld [vmem:[%s2628_s28 + $0x58] sm:$0xff]   ;;  %v1928_v9 = vld [vmem:[%s2628_s28 + $0x60] sm:$0x1]  ;;  %v305_v17 = vld [vmem:[%s2628_s28 + $0x10] sm:$0x1]  ;;  %vm495_vm3 = vcmask 64512  }
  0x24   : > { %2107 = vmatpush3.bf16.msra.mxu1 %v2356_v1  ;;  %2110 = vmatprep.mubr.msk.bf16.mxu1 %vm2505_vm1, %v2504_v2  ;;  %v308_v10 = vshrl.u32 %v307_v8, 7  ;;  %v373_v13 = vunpack.c.l.bf16 %v1928_v9  ;;  %v306_v19 = vunpack.c.l.bf16 %v305_v17  ;;  %v2360_v30 = vld [vmem:[%s2628_s28 + $0xa0] sm:$0xff]   ;;  %v2361_v31 = vld [vmem:[%s2628_s28 + $0xa8] sm:$0xff]   ;;  %v1936_v38 = vld [vmem:[%s2628_s28 + $0xb0] sm:$0x1]  ;;  %vm559_vm4 = vcmask 1043456  }
  0x25   : > { %v2648_v4 = vld [vmem:[#allocation2] sm:$0xff]  ;;  %2108 = vmatprep.subr.bf16.mxu1 %v2504_v2  ;;  %2126 = vmatprep.mubr.msk.bf16.mxu0 %vm2505_vm1, %v2504_v2  ;;  %v436_v39 = vunpack.c.l.bf16 %v1936_v38  ;;  %v2364_v53 = vld [vmem:[%s2628_s28 + $0x14] sm:$0xff]   ;;  %v2363_v60 = vld [vmem:[%s2628_s28 + $0x6c] sm:$0xff]   ;;  %s2506_s20 = smov 8   ;;  %s2507_s24 = smov 16   ;;  %vm1507_vm5 = vcmask 130048  }
  0x26   : > { %v2655_v5 = vpack.c.bf16 %v2648_v4, %v2648_v4  ;;  %v2671_v15 = vsub.s32 0, %v308_v10  ;;  %2123 = vmatpush3.bf16.msra.mxu0 %v2360_v30  ;;  %v2365_v54 = vld [vmem:[%s2628_s28 + $0x1c] sm:$0xff]   ;;  %v2362_v58 = vld [vmem:[%s2628_s28 + $0x64] sm:$0xff]   ;;  %v1954_v1 = vld [vmem:[%s2628_s28 + $0x74] sm:$0x1]  ;;  %vm1509_vm6 = vcmask 195584  }
  0x27   : > { %2124 = vmatprep.subr.bf16.mxu0 %v2504_v2  ;;  %v1946_v9 = vld [vmem:[%s2628_s28 + $0x24] sm:$0x1]  ;;  %s2509_s29 = smov 96   ;;  %vm1687_vm7 = vcmask 523264   ;;  %s2511_s9 = smov 64  }
  0x28   : > { %2109 = vmatpush3.bf16.msra.mxu1 %v2357_v3  ;;  %v377_v18 = vrot.slane %v373_v13, %v2671_v15  ;;  %v310_v24 = vrot.slane %v306_v19, %v2671_v15  ;;  %v440_v40 = vrot.slane %v436_v39, %v2671_v15  ;;  %p2039_p1 = scmp.ne.s32.totalorder %s2486_s21, 1 }
  0x29   : > { %2114 = vmatprep.subr.bf16.mxu1 %v2504_v2  ;;  %s2512_s14 = smov (!%p2039_p1), 96  }
  0x2a   : > { %2125 = vmatpush3.bf16.msra.mxu0 %v2361_v31 }
  0x2b   : > { %2111 = vmatmul.mubr.msk.bf16.vlgmr.msra.gmra.mrb[0].mxu1 %vm323_vm2, %v2655_v5  ;;  %2136 = vmatprep.subr.bf16.mxu0 %v2504_v2 }
  0x2c   : > { %2115 = vmatpush3.bf16.msra.mxu1 %v2358_v6  ;;  %2118 = vmatprep.mubr.msk.bf16.mxu1 %vm2505_vm1, %v2504_v2 }
  0x2d   : > { %2116 = vmatprep.subr.bf16.mxu1 %v2504_v2  ;;  %2127 = vmatmul.mubr.msk.bf16.vlgmr.msra.gmra.mrb[0].mxu0 %vm323_vm2, %v2655_v5 }
  0x2e   : > { %2138 = vmatprep.mubr.msk.bf16.mxu0 %vm2505_vm1, %v2504_v2 }
  0x30   : > { %2117 = vmatpush3.bf16.msra.mxu1 %v2359_v7  ;;  %v672_v7 = vunpack.c.l.bf16 %v1954_v1 }
  0x31   : > { %2130 = vmatprep.subr.bf16.mxu1 %v2504_v2 }
  0x33   : > { %2119 = vmatmul.mubr.msk.bf16.vlgmr.msra.gmra.mrb[4].mxu1 %vm323_vm2, %v2655_v5 }
  0x34   : > { %2132 = vmatprep.mubr.msk.bf16.mxu1 %vm2505_vm1, %v2504_v2 }
  0xfe   : > { %v361_v11 = vpop.f32.mrb[0].mxu1 }
  0xff   : > { %v2112_v12 = vpop.f32.mrb[1].mxu1  ;;  %v362_v28 = vadd.f32 %v361_v11, %v310_v24  ;;  %v676_v11 = vrot.slane %v672_v7, %v2671_v15  ;;  %v2366_v24 = vld [vmem:[%s2628_s28 + $0xb4] sm:$0xff]  }
 0x100   : > { %v364_v14 = vpop.f32.mrb[2].mxu1  ;;  %v487_v41 = vpop.f32.mrb[0].mxu0  ;;  %v609_v12 = vunpack.c.l.bf16 %v1946_v9 }
 0x101   : > { %v2113_v16 = vpop.f32.mrb[3].mxu1  ;;  %v493_v29 = vpack.c.bf16 %v362_v28, %v362_v28  ;;  %v488_v42 = vadd.f32 %v487_v41, %v440_v40  ;;  %v2128_v43 = vpop.f32.mrb[1].mxu0 }
 0x102   : > { %v490_v44 = vpop.f32.mrb[2].mxu0  ;;  %v613_v17 = vrot.slane %v609_v12, %v2671_v15 }
 0x103   : > { %v555_v45 = vpack.c.bf16 %v488_v42, %v488_v42  ;;  %v2129_v46 = vpop.f32.mrb[3].mxu0 }
 0x105   : > { %v561_v47 = vsel %vm559_vm4, %v555_v45, 0 }
 0x106   : > { %v424_v20 = vpop.f32.mrb[4].mxu1  ;;  %2137 = vmatpush3.bf16.msra.mxu0 %v561_v47  ;;  %v2370_v47 = vld [vmem:[%s2628_s28 + $0x28] sm:$0xff]  }
 0x107   : > { %v425_v21 = vadd.f32 %v424_v20, %v377_v18  ;;  %v2120_v22 = vpop.f32.mrb[5].mxu1  ;;  %2150 = vmatprep.subr.bf16.mxu0 %v2504_v2 }
 0x108   : > { %v427_v23 = vpop.f32.mrb[6].mxu1 }
 0x109   : > { %v494_v25 = vpack.c.bf16 %v425_v21, %v425_v21  ;;  %v2121_v26 = vpop.f32.mrb[7].mxu1 }
 0x10b   : > { %v500_v27 = vsel %vm495_vm3, %v494_v25, 0  ;;  %v2367_v25 = vld [vmem:[%s2628_s28 + $0xbc] sm:$0xff]  }
 0x10c   : > { %2131 = vmatpush3.bf16.xpose.msra.mxu1 %v500_v27 }
 0x10d   : > { %2142 = vmatprep.subr.bf16.mxu1 %v2504_v2 }
 0x113   : > { %2133 = vmatmul.mubr.msk.bf16.vlgmr.msra.gmra.mrb[8].mxu1 %vm495_vm3, %v493_v29 }
 0x114   : > { %2146 = vmatprep.mubr.msk.bf16.mxu1 %vm2505_vm1, %v2504_v2  ;;  %2143 = vmatpush3.bf16.msra.mxu1 %v2364_v53 }
 0x115   : > { %2144 = vmatprep.subr.bf16.mxu1 %v2504_v2 }
 0x118   : > { %2145 = vmatpush3.bf16.msra.mxu1 %v2365_v54  ;;  %v2369_v54 = vld [vmem:[%s2628_s28 + $0x80] sm:$0xff]  }
 0x119   : > { %2158 = vmatprep.subr.bf16.mxu1 %v2504_v2 }
 0x11b   : > { %2147 = vmatmul.mubr.msk.bf16.vlgmr.msra.gmra.mrb[12].mxu1 %vm323_vm2, %v2655_v5 }
 0x11c   : > { %2162 = vmatprep.mubr.msk.bf16.mxu1 %vm2505_vm1, %v2504_v2  ;;  %2159 = vmatpush3.bf16.msra.mxu1 %v2366_v24 }
 0x11d   : > { %2160 = vmatprep.subr.bf16.mxu1 %v2504_v2 }
 0x120   : > { %2161 = vmatpush3.bf16.msra.mxu1 %v2367_v25 }
 0x121   : > { %2172 = vmatprep.subr.bf16.mxu1 %v2504_v2 }
 0x123   : > { %2163 = vmatmul.mubr.msk.bf16.vlgmr.msra.gmra.mrb[16].mxu1 %vm323_vm2, %v2655_v5 }
 0x124   : > { %2174 = vmatprep.mubr.msk.bf16.mxu1 %vm2505_vm1, %v2504_v2 }
 0x1e6   : > { %v536_v32 = vpop.f32.mrb[8].mxu1 }
 0x1e7   : > { %v542_v33 = vmul.f32 0.35355338, %v536_v32  ;;  %v2134_v34 = vpop.f32.mrb[9].mxu1 }
 0x1e8   : > { %v539_v35 = vpop.f32.mrb[10].mxu1 }
 0x1e9   : > { %v2135_v36 = vpop.f32.mrb[11].mxu1  ;;  %v543_v37 = vsel %vm495_vm3, %v542_v33, -inf }
 0x1ea   : > { %544 = vmax.xlane.f32.xlu0 %v543_v37  ;;  %v1962_v37 = vld [vmem:[%s2628_s28 + $0xc4] sm:$0x1] }
 0x1eb   : > { %v735_v38 = vunpack.c.l.bf16 %v1962_v37 }
 0x1ed   : > { %v739_v41 = vrot.slane %v735_v38, %v2671_v15 }
 0x1ee   : > { %v660_v61 = vpop.f32.mrb[12].mxu1 }
 0x1ef   : > { %v2148_v62 = vpop.f32.mrb[13].mxu1  ;;  %v661_v22 = vadd.f32 %v660_v61, %v613_v17 }
 0x1f0   : > { %v663_v63 = vpop.f32.mrb[14].mxu1 }
 0x1f1   : > { %v2149_v0 = vpop.f32.mrb[15].mxu1  ;;  %v792_v23 = vpack.c.bf16 %v661_v22, %v661_v22 }
 0x1f2   : > { %v1972_v0 = vld [vmem:[%s2628_s28 + $0x38] sm:$0x1] }
 0x1f3   : > { %v906_v7 = vunpack.c.l.bf16 %v1972_v0 }
 0x1f6   : > { %v786_v39 = vpop.f32.mrb[16].mxu1 }
 0x1f7   : > { %v2164_v40 = vpop.f32.mrb[17].mxu1  ;;  %v787_v44 = vadd.f32 %v786_v39, %v739_v41 }
 0x1f8   : > { %v789_v42 = vpop.f32.mrb[18].mxu1 }
 0x1f9   : > { %v2165_v43 = vpop.f32.mrb[19].mxu1  ;;  %v853_v45 = vpack.c.bf16 %v787_v44, %v787_v44  ;;  %v2376_v42 = vld [vmem:[%s2628_s28 + $0x3c] sm:$0xff]  }
 0x1fa   : > { %v2377_v43 = vld [vmem:[%s2628_s28 + $0x44] sm:$0xff]  }
 0x1fb   : > { %v858_v46 = vsel %vm559_vm4, %v853_v45, 0 }
 0x1fc   : > { %2173 = vmatpush3.bf16.msra.mxu1 %v858_v46 }
 0x1fd   : > { %2186 = vmatprep.subr.bf16.mxu1 %v2504_v2 }
 0x277   : > { %v545_v48 = vpop.xlane.xlu0 %544 }
 0x278   : > { %v546_v49 = vsub.f32 %v542_v33, %v545_v48  ;;  %v2371_v48 = vld [vmem:[%s2628_s28 + $0x30] sm:$0xff]  }
 0x27a   : > { %v547_v50 = vmul.f32 1.442695, %v546_v49 }
 0x27c   : > { %2386 = vpow2.f32 %v547_v50 }
 0x286   : > { %v2387_v51 = vpop.eup %2386 }
 0x287   : > { %v549_v52 = vsel %vm495_vm3, %v2387_v51, 0.0 }
 0x288   : > { %550 = vadd.xlane.f32.xlu0 %v549_v52  ;;  %v2368_v52 = vld [vmem:[%s2628_s28 + $0x78] sm:$0xff]  }
 0x315   : > { %v551_v55 = vpop.xlane.xlu0 %550 }
 0x316   : > { %2388 = vrcp.f32 %v551_v55 }
 0x320   : > { %v2389_v56 = vpop.eup %2388 }
 0x321   : > { %v553_v57 = vmul.f32 %v2389_v56, %v2387_v51 }
 0x323   : > { %v554_v59 = vpack.c.bf16 %v553_v57, %v553_v57 }
 0x325   : > { %2139 = vmatmul.mubr.msk.bf16.vlgmr.msra.gmra.mrb[4].mxu0 %vm495_vm3, %v554_v59  ;;  %v1980_v59 = vld [vmem:[%s2628_s28 + $0x88] sm:$0x1] }
 0x326   : > { %2151 = vmatpush3.bf16.msra.mxu0 %v2362_v58  ;;  %2154 = vmatprep.mubr.msk.bf16.mxu0 %vm2505_vm1, %v2504_v2  ;;  %v969_v62 = vunpack.c.l.bf16 %v1980_v59  ;;  %v1998_v59 = vld [vmem:[%s2628_s28 + $0x4c] sm:$0x1] }
 0x327   : > { %2152 = vmatprep.subr.bf16.mxu0 %v2504_v2 }
 0x32a   : > { %2153 = vmatpush3.bf16.msra.mxu0 %v2363_v60 }
 0x32b   : > { %2166 = vmatprep.subr.bf16.mxu0 %v2504_v2 }
 0x32d   : > { %2155 = vmatmul.mubr.msk.bf16.vlgmr.msra.gmra.mrb[8].mxu0 %vm323_vm2, %v2655_v5 }
 0x32e   : > { %2168 = vmatprep.mubr.msk.bf16.mxu0 %vm2505_vm1, %v2504_v2 }
 0x3f8   : > { %v2715_v3 = vpop.f32.mrb[4].mxu0 }
 0x3f9   : > { %v2140_v6 = vpop.f32.mrb[5].mxu0 }
 0x3fa   : > { %v600_v8 = vpop.f32.mrb[6].mxu0  ;;  %v973_v6 = vrot.slane %v969_v62, %v2671_v15 }
 0x3fb   : > { %v2141_v10 = vpop.f32.mrb[7].mxu0 }
 0x400   : > { %v723_v13 = vpop.f32.mrb[8].mxu0 }
 0x401   : > { %v724_v14 = vadd.f32 %v723_v13, %v676_v11  ;;  %v2156_v16 = vpop.f32.mrb[9].mxu0  ;;  %v910_v11 = vrot.slane %v906_v7, %v2671_v15 }
 0x402   : > { %v726_v18 = vpop.f32.mrb[10].mxu0 }
 0x403   : > { %v793_v19 = vpack.c.bf16 %v724_v14, %v724_v14  ;;  %v2157_v20 = vpop.f32.mrb[11].mxu0 }
 0x404   : > { %v2373_v20 = vld [vmem:[%s2628_s28 + $0xd0] sm:$0xff]  }
 0x405   : > { %v798_v21 = vsel %vm495_vm3, %v793_v19, 0  ;;  %v2372_v19 = vld [vmem:[%s2628_s28 + $0xc8] sm:$0xff]  }
 0x406   : > { %2167 = vmatpush3.bf16.xpose.msra.mxu0 %v798_v21 }
 0x407   : > { %2178 = vmatprep.subr.bf16.mxu0 %v2504_v2 }
 0x40d   : > { %2169 = vmatmul.mubr.msk.bf16.vlgmr.msra.gmra.mrb[12].mxu0 %vm495_vm3, %v792_v23 }
 0x40e   : > { %2182 = vmatprep.mubr.msk.bf16.mxu0 %vm2505_vm1, %v2504_v2  ;;  %2179 = vmatpush3.bf16.msra.mxu0 %v2370_v47  ;;  %v2374_v47 = vld [vmem:[%s2628_s28 + $0x8c] sm:$0xff]  }
 0x40f   : > { %2180 = vmatprep.subr.bf16.mxu0 %v2504_v2 }
 0x412   : > { %2181 = vmatpush3.bf16.msra.mxu0 %v2371_v48 }
 0x413   : > { %2194 = vmatprep.subr.bf16.mxu0 %v2504_v2 }
 0x415   : > { %2183 = vmatmul.mubr.msk.bf16.vlgmr.msra.gmra.mrb[16].mxu0 %vm323_vm2, %v2655_v5 }
 0x416   : > { %2198 = vmatprep.mubr.msk.bf16.mxu0 %vm2505_vm1, %v2504_v2  ;;  %2195 = vmatpush3.bf16.msra.mxu0 %v2372_v19 }
 0x417   : > { %2196 = vmatprep.subr.bf16.mxu0 %v2504_v2 }
 0x41a   : > { %2197 = vmatpush3.bf16.msra.mxu0 %v2373_v20 }
 0x41b   : > { %2208 = vmatprep.subr.bf16.mxu0 %v2504_v2 }
 0x41d   : > { %2199 = vmatmul.mubr.msk.bf16.vlgmr.msra.gmra.mrb[20].mxu0 %vm323_vm2, %v2655_v5 }
 0x41e   : > { %2210 = vmatprep.mubr.msk.bf16.mxu0 %vm2505_vm1, %v2504_v2 }
 0x4e0   : > { %v834_v26 = vpop.f32.mrb[12].mxu0 }
 0x4e1   : > { %v840_v27 = vmul.f32 0.35355338, %v834_v26  ;;  %v2170_v28 = vpop.f32.mrb[13].mxu0 }
 0x4e2   : > { %v837_v29 = vpop.f32.mrb[14].mxu0 }
 0x4e3   : > { %v2171_v30 = vpop.f32.mrb[15].mxu0  ;;  %v841_v31 = vsel %vm495_vm3, %v840_v27, -inf }
 0x4e4   : > { %842 = vmax.xlane.f32.xlu1 %v841_v31 }
 0x4e8   : > { %v957_v55 = vpop.f32.mrb[16].mxu0 }
 0x4e9   : > { %v2184_v56 = vpop.f32.mrb[17].mxu0  ;;  %v958_v17 = vadd.f32 %v957_v55, %v910_v11 }
 0x4ea   : > { %v960_v57 = vpop.f32.mrb[18].mxu0 }
 0x4eb   : > { %v2185_v58 = vpop.f32.mrb[19].mxu0  ;;  %v1089_v18 = vpack.c.bf16 %v958_v17, %v958_v17 }
 0x4f0   : > { %v1083_v30 = vpop.f32.mrb[20].mxu0 }
 0x571   : > { %v843_v32 = vpop.xlane.xlu1 %842 }
 0x572   : > { %v844_v33 = vsub.f32 %v840_v27, %v843_v32  ;;  %v1988_v27 = vld [vmem:[%s2628_s28 + $0xd8] sm:$0x1]  ;;  %v2200_v32 = vpop.f32.mrb[21].mxu0 }
 0x573   : > { %v1032_v28 = vunpack.c.l.bf16 %v1988_v27  ;;  %v2014_v27 = vld [vmem:[%s2628_s28 + $0xec] sm:$0x1] }
 0x574   : > { %v845_v34 = vmul.f32 1.442695, %v844_v33  ;;  %v1086_v33 = vpop.f32.mrb[22].mxu0 }
 0x575   : > { %v1036_v29 = vrot.slane %v1032_v28, %v2671_v15  ;;  %v1329_v28 = vunpack.c.l.bf16 %v2014_v27 }
 0x576   : > { %2390 = vpow2.f32 %v845_v34 }
 0x577   : > { %v1084_v31 = vadd.f32 %v1083_v30, %v1036_v29 }
 0x579   : > { %v1150_v34 = vpack.c.bf16 %v1084_v31, %v1084_v31  ;;  %v1333_v31 = vrot.slane %v1329_v28, %v2671_v15 }
 0x580   : > { %v2391_v35 = vpop.eup %2390 }
 0x581   : > { %v847_v36 = vsel %vm495_vm3, %v2391_v35, 0.0 }
 0x582   : > { %848 = vadd.xlane.f32.xlu1 %v847_v36  ;;  %v1155_v36 = vsel %vm559_vm4, %v1150_v34, 0 }
 0x583   : > { %2209 = vmatpush3.bf16.msra.mxu0 %v1155_v36 }
 0x584   : > { %2222 = vmatprep.subr.bf16.mxu0 %v2504_v2 }
 0x60f   : > { %v849_v49 = vpop.xlane.xlu1 %848 }
 0x610   : > { %2392 = vrcp.f32 %v849_v49  ;;  %v2375_v49 = vld [vmem:[%s2628_s28 + $0x94] sm:$0xff]  }
 0x61a   : > { %v2393_v50 = vpop.eup %2392 }
 0x61b   : > { %v851_v51 = vmul.f32 %v2393_v50, %v2391_v35  ;;  %v2201_v35 = vpop.f32.mrb[23].mxu0 }
 0x61d   : > { %v852_v53 = vpack.c.bf16 %v851_v51, %v851_v51 }
 0x61f   : > { %2175 = vmatmul.mubr.msk.bf16.vlgmr.msra.gmra.mrb[20].mxu1 %vm495_vm3, %v852_v53 }
 0x620   : > { %2187 = vmatpush3.bf16.msra.mxu1 %v2368_v52  ;;  %2190 = vmatprep.mubr.msk.bf16.mxu1 %vm2505_vm1, %v2504_v2 }
 0x621   : > { %2188 = vmatprep.subr.bf16.mxu1 %v2504_v2 }
 0x624   : > { %2189 = vmatpush3.bf16.msra.mxu1 %v2369_v54  ;;  %v2006_v54 = vld [vmem:[%s2628_s28 + $0x9c] sm:$0x1] }
 0x625   : > { %2202 = vmatprep.subr.bf16.mxu1 %v2504_v2  ;;  %v1266_v57 = vunpack.c.l.bf16 %v2006_v54 }
 0x627   : > { %2191 = vmatmul.mubr.msk.bf16.vlgmr.msra.gmra.mrb[24].mxu1 %vm323_vm2, %v2655_v5  ;;  %v1270_v62 = vrot.slane %v1266_v57, %v2671_v15 }
 0x628   : > { %2204 = vmatprep.mubr.msk.bf16.mxu1 %vm2505_vm1, %v2504_v2 }
 0x6f2   : > { %v2759_v60 = vpop.f32.mrb[20].mxu1 }
 0x6f3   : > { %v2176_v61 = vpop.f32.mrb[21].mxu1 }
 0x6f4   : > { %v897_v63 = vpop.f32.mrb[22].mxu1 }
 0x6f5   : > { %v2177_v1 = vpop.f32.mrb[23].mxu1  ;;  %v1203_v63 = vunpack.c.l.bf16 %v1998_v59 }
 0x6f7   : > { %v1207_v7 = vrot.slane %v1203_v63, %v2671_v15  ;;  %v2380_v15 = vld [vmem:[%s2638_s12] sm:$0xff]  }
 0x6fa   : > { %v1020_v8 = vpop.f32.mrb[24].mxu1 }
 0x6fb   : > { %v1021_v9 = vadd.f32 %v1020_v8, %v973_v6  ;;  %v2192_v10 = vpop.f32.mrb[25].mxu1 }
 0x6fc   : > { %v1023_v12 = vpop.f32.mrb[26].mxu1 }
 0x6fd   : > { %v1090_v13 = vpack.c.bf16 %v1021_v9, %v1021_v9  ;;  %v2193_v14 = vpop.f32.mrb[27].mxu1 }
 0x6fe   : > { %v2378_v14 = vld [vmem:[%s2628_s28 + $0xdc] sm:$0xff]  }
 0x6ff   : > { %v1095_v16 = vsel %vm495_vm3, %v1090_v13, 0 }
 0x700   : > { %2203 = vmatpush3.bf16.xpose.msra.mxu1 %v1095_v16  ;;  %v2379_v16 = vld [vmem:[%s2628_s28 + $0xe4] sm:$0xff]   ;;  %s2508_s28 = smov 24  }
 0x701   : > { %2214 = vmatprep.subr.bf16.mxu1 %v2504_v2 }
 0x707   : > { %2205 = vmatmul.mubr.msk.bf16.vlgmr.msra.gmra.mrb[28].mxu1 %vm495_vm3, %v1089_v18 }
 0x708   : > { %2218 = vmatprep.mubr.msk.bf16.mxu1 %vm2505_vm1, %v2504_v2  ;;  %2215 = vmatpush3.bf16.msra.mxu1 %v2376_v42 }
 0x709   : > { %2216 = vmatprep.subr.bf16.mxu1 %v2504_v2 }
 0x70c   : > { %2217 = vmatpush3.bf16.msra.mxu1 %v2377_v43 }
 0x70d   : > { %2230 = vmatprep.subr.bf16.mxu1 %v2504_v2 }
 0x70f   : > { %2219 = vmatmul.mubr.msk.bf16.vlgmr.msra.gmra.mrb[32].mxu1 %vm323_vm2, %v2655_v5 }
 0x710   : > { %2234 = vmatprep.mubr.msk.bf16.mxu1 %vm2505_vm1, %v2504_v2  ;;  %2231 = vmatpush3.bf16.msra.mxu1 %v2378_v14 }
 0x711   : > { %2232 = vmatprep.subr.bf16.mxu1 %v2504_v2 }
 0x714   : > { %2233 = vmatpush3.bf16.msra.mxu1 %v2379_v16 }
 0x715   : > { %2244 = vmatprep.subr.bf16.mxu1 %v2504_v2 }
 0x717   : > { %2235 = vmatmul.mubr.msk.bf16.vlgmr.msra.gmra.mrb[36].mxu1 %vm323_vm2, %v2655_v5 }
 0x718   : > { %2246 = vmatprep.mubr.msk.bf16.mxu1 %vm2505_vm1, %v2504_v2 }
 0x7da   : > { %v1131_v21 = vpop.f32.mrb[28].mxu1 }
 0x7db   : > { %v1137_v22 = vmul.f32 0.35355338, %v1131_v21  ;;  %v2206_v23 = vpop.f32.mrb[29].mxu1 }
 0x7dc   : > { %v1134_v24 = vpop.f32.mrb[30].mxu1 }
 0x7dd   : > { %v2207_v25 = vpop.f32.mrb[31].mxu1  ;;  %v1138_v26 = vsel %vm495_vm3, %v1137_v22, -inf }
 0x7de   : > { %1139 = vmax.xlane.f32.xlu0 %v1138_v26 }
 0x7e2   : > { %v1254_v50 = vpop.f32.mrb[32].mxu1 }
 0x7e3   : > { %v2220_v51 = vpop.f32.mrb[33].mxu1  ;;  %v1255_v12 = vadd.f32 %v1254_v50, %v1207_v7  ;;  %v2384_v7 = vld [vmem:[%s2638_s12 + $0x20] sm:$0xff]  }
 0x7e4   : > { %v1257_v52 = vpop.f32.mrb[34].mxu1 }
 0x7e5   : > { %v2221_v53 = vpop.f32.mrb[35].mxu1  ;;  %v1386_v13 = vpack.c.bf16 %v1255_v12, %v1255_v12  ;;  %v2020_v52 = vld [vmem:[%s2633_s23] ss:$0 sm:$0xff] }
 0x7ea   : > { %v1380_v29 = vpop.f32.mrb[36].mxu1 }
 0x7eb   : > { %v2236_v30 = vpop.f32.mrb[37].mxu1 }
 0x7ec   : > { %v1383_v32 = vpop.f32.mrb[38].mxu1 }
 0x7ed   : > { %v2237_v33 = vpop.f32.mrb[39].mxu1 }
 0x86b   : > { %v1140_v37 = vpop.xlane.xlu0 %1139 }
 0x86c   : > { %v1141_v38 = vsub.f32 %v1137_v22, %v1140_v37 }
 0x86e   : > { %v1142_v39 = vmul.f32 1.442695, %v1141_v38 }
 0x870   : > { %2394 = vpow2.f32 %v1142_v39 }
 0x87a   : > { %v2395_v40 = vpop.eup %2394 }
 0x87b   : > { %v1144_v41 = vsel %vm495_vm3, %v2395_v40, 0.0 }
 0x87c   : > { %1145 = vadd.xlane.f32.xlu1 %v1144_v41 }
 0x909   : > { %v1146_v44 = vpop.xlane.xlu1 %1145 }
 0x90a   : > { %2396 = vrcp.f32 %v1146_v44 }
 0x914   : > { %v2397_v45 = vpop.eup %2396 }
 0x915   : > { %v1148_v46 = vmul.f32 %v2397_v45, %v2395_v40  ;;  %v2381_v40 = vld [vmem:[%s2638_s12 + $0x8] sm:$0xff]  }
 0x917   : > { %v1149_v48 = vpack.c.bf16 %v1148_v46, %v1148_v46 }
 0x919   : > { %2211 = vmatmul.mubr.msk.bf16.vlgmr.msra.gmra.mrb[24].mxu0 %vm495_vm3, %v1149_v48 }
 0x91a   : > { %2223 = vmatpush3.bf16.msra.mxu0 %v2374_v47  ;;  %2226 = vmatprep.mubr.msk.bf16.mxu0 %vm2505_vm1, %v2504_v2 }
 0x91b   : > { %2224 = vmatprep.subr.bf16.mxu0 %v2504_v2 }
 0x91e   : > { %2225 = vmatpush3.bf16.msra.mxu0 %v2375_v49 }
 0x91f   : > { %2238 = vmatprep.subr.bf16.mxu0 %v2504_v2 }
 0x921   : > { %2227 = vmatmul.mubr.msk.bf16.vlgmr.msra.gmra.mrb[28].mxu0 %vm323_vm2, %v2655_v5 }
 0x922   : > { %2240 = vmatprep.mubr.msk.bf16.mxu0 %vm2505_vm1, %v2504_v2 }
 0x9ec   : > { %v1191_v55 = vpop.f32.mrb[24].mxu0 }
 0x9ed   : > { %v2212_v56 = vpop.f32.mrb[25].mxu0 }
 0x9ee   : > { %v1194_v58 = vpop.f32.mrb[26].mxu0 }
 0x9ef   : > { %v2213_v61 = vpop.f32.mrb[27].mxu0 }
 0x9f4   : > { %v1317_v0 = vpop.f32.mrb[28].mxu0 }
 0x9f5   : > { %v1318_v1 = vadd.f32 %v1317_v0, %v1270_v62  ;;  %v2228_v6 = vpop.f32.mrb[29].mxu0 }
 0x9f6   : > { %v1320_v8 = vpop.f32.mrb[30].mxu0  ;;  %v2024_v6 = vld [vmem:[%s2633_s23 + $0x1] ss:$0 sm:$0xff]  ;;  %s2510_s23 = smov 32  }
 0x9f7   : > { %v1387_v9 = vpack.c.bf16 %v1318_v1, %v1318_v1  ;;  %v2229_v10 = vpop.f32.mrb[31].mxu0  ;;  %v2382_v1 = vld [vmem:[%s2638_s12 + $0x10] sm:$0xff]   ;;  %v1692_v8 = vsel %vm1687_vm7, %v2384_v7, 0 }
 0x9f9   : > { %v1392_v11 = vsel %vm495_vm3, %v1387_v9, 0  ;;  %v2385_v9 = vld [vmem:[%s2638_s12 + $0x28] sm:$0xff]  }
 0x9fa   : > { %2239 = vmatpush3.bf16.xpose.msra.mxu0 %v1392_v11  ;;  %v1695_v10 = vsel %vm1687_vm7, %v2385_v9, 0 }
 0x9fb   : > { %2250 = vmatprep.subr.bf16.mxu0 %v2504_v2 }
 0xa01   : > { %2241 = vmatmul.mubr.msk.bf16.vlgmr.msra.gmra.mrb[32].mxu0 %vm495_vm3, %v1386_v13 }
 0xa02   : > { %2254 = vmatprep.mubr.msk.bf16.mxu0 %vm2505_vm1, %v2504_v2  ;;  %2251 = vmatpush3.bf16.msra.mxu0 %v2380_v15 }
 0xa03   : > { %2252 = vmatprep.subr.bf16.mxu0 %v2504_v2 }
 0xa06   : > { %2253 = vmatpush3.bf16.msra.mxu0 %v2381_v40 }
 0xa07   : > { %2266 = vmatprep.subr.bf16.mxu0 %v2504_v2 }
 0xad4   : > { %v1428_v17 = vpop.f32.mrb[32].mxu0 }
 0xad5   : > { %v1434_v18 = vmul.f32 0.35355338, %v1428_v17  ;;  %v2242_v19 = vpop.f32.mrb[33].mxu0 }
 0xad6   : > { %v1431_v20 = vpop.f32.mrb[34].mxu0 }
 0xad7   : > { %v2243_v21 = vpop.f32.mrb[35].mxu0  ;;  %v1435_v22 = vsel %vm495_vm3, %v1434_v18, -inf }
 0xad8   : > { %1436 = vmax.xlane.f32.xlu0 %v1435_v22 }
 0xaee   : > { %1495 = vrot.lane.b32.xlu0 %v2759_v60, %s2506_s20  ;;  %v1381_v60 = vadd.f32 %v1380_v29, %v1333_v31 }
 0xaf0   : > { %v1447_v34 = vpack.c.bf16 %v1381_v60, %v1381_v60 }
 0xaf2   : > { %v1452_v35 = vsel %vm559_vm4, %v1447_v34, 0 }
 0xaf3   : > { %2245 = vmatpush3.bf16.msra.mxu1 %v1452_v35 }
 0xaf4   : > { %2258 = vmatprep.subr.bf16.mxu1 %v2504_v2 }
 0xb65   : > { %v1437_v23 = vpop.xlane.xlu0 %1436 }
 0xb66   : > { %v1438_v24 = vsub.f32 %v1434_v18, %v1437_v23 }
 0xb68   : > { %v1439_v25 = vmul.f32 1.442695, %v1438_v24 }
 0xb69   : > { %v1496_v45 = vpop.permute.xlu0 %1495 }
 0xb6a   : > { %2398 = vpow2.f32 %v1439_v25  ;;  %v1506_v47 = vsel %vm495_vm3, %v2715_v3, %v1496_v45 }
 0xb74   : > { %v2399_v5 = vpop.eup %2398 }
 0xb75   : > { %v1441_v26 = vsel %vm495_vm3, %v2399_v5, 0.0 }
 0xb76   : > { %1442 = vadd.xlane.f32.xlu1 %v1441_v26 }
 0xb87   : > { %1499 = vrot.lane.b32.xlu1 %v1191_v55, %s2507_s24 }
 0xc03   : > { %v1443_v36 = vpop.xlane.xlu1 %1442 }
 0xc04   : > { %2400 = vrcp.f32 %v1443_v36 }
 0xc07   : > { %v1500_v46 = vpop.permute.xlu1 %1499 }
 0xc08   : > { %v1508_v48 = vsel %vm1507_vm5, %v1506_v47, %v1500_v46 }
 0xc0e   : > { %v2401_v37 = vpop.eup %2400 }
 0xc0f   : > { %v1445_v38 = vmul.f32 %v2401_v37, %v2399_v5 }
 0xc11   : > { %v1446_v39 = vpack.c.bf16 %v1445_v38, %v1445_v38 }
 0xc13   : > { %2247 = vmatmul.mubr.msk.bf16.vlgmr.msra.gmra.mrb[40].mxu1 %vm495_vm3, %v1446_v39 }
 0xc14   : > { %2262 = vmatprep.mubr.msk.bf16.mxu1 %vm2505_vm1, %v2504_v2  ;;  %2259 = vmatpush3.bf16.msra.mxu1 %v2382_v1 }
 0xc15   : > { %2260 = vmatprep.subr.bf16.mxu1 %v2504_v2 }
 0xce6   : > { %v1488_v41 = vpop.f32.mrb[40].mxu1 }
 0xce7   : > { %1503 = vrot.lane.b32.xlu1 %v1488_v41, %s2508_s28  ;;  %v2248_v42 = vpop.f32.mrb[41].mxu1 }
 0xce8   : > { %v1491_v43 = vpop.f32.mrb[42].mxu1 }
 0xce9   : > { %v2249_v44 = vpop.f32.mrb[43].mxu1 }
 0xd59   : > { %v1504_v49 = vpop.permute.xlu1 %1503 }
 0xd5a   : > { %v1510_v50 = vsel %vm1509_vm6, %v1508_v48, %v1504_v49  ;;  %v2040_v48 = vld [vmem:[%s2924_s4] ss:$0 sm:$0xff] (!%p2039_p1) }
 0xd5b   : > { %v1515_v51 = vpack.c.bf16 %v1510_v50, %v1510_v50 }
 0xd5d   : > { %2255 = vmatmul.mubr.msk.bf16.vlgmr.msra.gmra.mrb[36].mxu0 %vm323_vm2, %v1515_v51 }
 0xd5e   : > { %2270 = vmatprep.mubr.msk.bf16.mxu0 %vm2505_vm1, %v2504_v2  ;;  %2267 = vmatpush3.bf16.xpose.msra.mxu0 %v1692_v8 }
 0xd5f   : > { %2268 = vmatprep.subr.bf16.mxu0 %v2504_v2 }
 0xd66   : > { %2269 = vmatpush3.bf16.xpose.msra.mxu0 %v1695_v10 }
 0xe30   : > { %v1571_v53 = vpop.f32.mrb[36].mxu0 }
 0xe31   : > { %v1572_v54 = vadd.f32 %v2020_v52, %v1571_v53  ;;  %v2256_v55 = vpop.f32.mrb[37].mxu0 }
 0xe32   : > { %v1574_v56 = vpop.f32.mrb[38].mxu0 }
 0xe33   : > { %v2257_v57 = vpop.f32.mrb[39].mxu0  ;;  %v1577_v58 = vadd.f32 %v1572_v54, %v2648_v4  ;;  %v2383_v4 = vld [vmem:[%s2638_s12 + $0x18] sm:$0xff]  }
 0xe34   : > { %2261 = vmatpush3.bf16.msra.mxu1 %v2383_v4 }
 0xe35   : > { %v1578_v3 = vsel %vm323_vm2, %v1577_v58, 0.0 }
 0xe36   : > { %1579 = vadd.xlane.f32.xlu1 %v1578_v3 }
 0xe47   : > { %1621 = vrot.lane.b32.xlu1 %v2020_v52, %s2509_s29 }
 0xe4b   : > { %1684 = vrot.lane.b32.xlu1 %v2020_v52, %s2510_s23 }
 0xec3   : > { %v1580_v59 = vpop.xlane.xlu1 %1579 }
 0xec4   : > { %v1582_v61 = vmul.f32 0.03125, %v1580_v59 }
 0xec6   : > { %v1583_v62 = vsub.f32 %v1577_v58, %v1582_v61 }
 0xec7   : > { %v1622_v21 = vpop.permute.xlu1 %1621 }
 0xec8   : > { %v1584_v63 = vmul.f32 %v1583_v62, %v1583_v62 }
 0xeca   : > { %v1585_v0 = vsel %vm323_vm2, %v1584_v63, 0.0 }
 0xecb   : > { %1586 = vadd.xlane.f32.xlu0 %v1585_v0  ;;  %v1685_v27 = vpop.permute.xlu1 %1684 }
 0xee1   : > { %1599 = vrot.lane.b32.xlu0 %v2024_v6, %s2509_s29 }
 0xf58   : > { %v1587_v11 = vpop.xlane.xlu0 %1586 }
 0xf59   : > { %v1588_v12 = vmul.f32 0.03125, %v1587_v11 }
 0xf5b   : > { %v1589_v13 = vadd.f32 1e-05, %v1588_v12 }
 0xf5c   : > { %v1600_v17 = vpop.permute.xlu0 %1599 }
 0xf5d   : > { %2402 = vrsqrt.f32 %v1589_v13 }
 0xf67   : > { %v2403_v14 = vpop.eup %2402 }
 0xf68   : > { %v1591_v16 = vmul.f32 %v2403_v14, %v1583_v62 }
 0xf6a   : > { %v1598_v18 = vmul.f32 %v2024_v6, %v1591_v16 }
 0xf6c   : > { %v1602_v19 = vadd.f32 %v1600_v17, %v1598_v18 }
 0xf6e   : > { %v1608_v20 = vpack.c.bf16 %v1602_v19, %v1602_v19 }
 0xf70   : > { %2263 = vmatmul.mubr.msk.bf16.vlgmr.msra.gmra.mrb[44].mxu1 %vm323_vm2, %v1608_v20 }
0x1043   : > { %v1661_v2 = vpop.f32.mrb[44].mxu1 }
0x1044   : > { %v1662_v22 = vadd.f32 %v1661_v2, %v1622_v21  ;;  %v2264_v23 = vpop.f32.mrb[45].mxu1 }
0x1045   : > { %v1664_v24 = vpop.f32.mrb[46].mxu1 }
0x1046   : > { %v1667_v25 = vmax.f32 %v1662_v22, 0.0  ;;  %v2265_v5 = vpop.f32.mrb[47].mxu1 }
0x1048   : > { %v1673_v26 = vpack.c.bf16 %v1667_v25, %v1667_v25 }
0x104a   : > { %2271 = vmatmul.mubr.msk.bf16.vlgmr.msra.gmra.mrb[40].mxu0 %vm1687_vm7, %v1673_v26 }
0x111d   : > { %v1731_v28 = vpop.f32.mrb[40].mxu0 }
0x111e   : > { %v1732_v29 = vadd.f32 %v1731_v28, %v1685_v27  ;;  %v2272_v30 = vpop.f32.mrb[41].mxu0 }
0x111f   : > { %v1734_v31 = vpop.f32.mrb[42].mxu0 }
0x1120   : > { %v2273_v32 = vpop.f32.mrb[43].mxu0  ;;  %v1737_v33 = vadd.f32 %v1732_v29, %v1602_v19 }
0x1122   : > { %v1738_v60 = vsel %vm323_vm2, %v1737_v33, 0.0 }
0x1123   : > { %1739 = vadd.xlane.f32.xlu0 %v1738_v60 }
0x1139   : > { %1751 = vrot.lane.b32.xlu0 %v2024_v6, %s2511_s9 }
0x11b0   : > { %v1740_v34 = vpop.xlane.xlu0 %1739 }
0x11b1   : > { %v1741_v35 = vmul.f32 0.03125, %v1740_v34 }
0x11b3   : > { %v1742_v36 = vsub.f32 %v1737_v33, %v1741_v35 }
0x11b4   : > { %v1752_v42 = vpop.permute.xlu0 %1751 }
0x11b5   : > { %v1743_v37 = vmul.f32 %v1742_v36, %v1742_v36 }
0x11b7   : > { %v1744_v38 = vsel %vm323_vm2, %v1743_v37, 0.0 }
0x11b8   : > { %1745 = vadd.xlane.f32.xlu1 %v1744_v38 }
0x11c9   : > { %1755 = vrot.lane.b32.xlu1 %v2024_v6, %s2510_s23 }
0x11cd   : > { %1785 = vrot.lane.b32.xlu1 (!%p2039_p1), %v2040_v48, %s2512_s14 }
0x1245   : > { %v1746_v39 = vpop.xlane.xlu1 %1745 }
0x1246   : > { %v1747_v15 = vmul.f32 0.03125, %v1746_v39 }
0x1248   : > { %v1748_v40 = vadd.f32 1e-05, %v1747_v15 }
0x1249   : > { %v1756_v44 = vpop.permute.xlu1 %1755 }
0x124a   : > { %2404 = vrsqrt.f32 %v1748_v40 }
0x124d   : > { %v1786_v3 = vpop.permute.xlu1 (!%p2039_p1), %1785 }
0x1254   : > { %v2405_v41 = vpop.eup %2404 }
0x1255   : > { %v1750_v43 = vmul.f32 %v2405_v41, %v1742_v36  ;;  %1763 = sbr.rel (%p2039_p1) target bundleno = 5013 (0x1395), region = 48 }
0x1257   : > { %v1754_v45 = vmul.f32 %v1752_v42, %v1750_v43 }
0x1259   : > { %v1758_v46 = vadd.f32 %v1756_v44, %v1754_v45 }
0x125b   : > { %1759 = vst.msk [vmem:[#allocation2] sm:$0xff] %vm323_vm2, %v1758_v46  ;;  %v1765_v47 = vsel (!%p2039_p1), %vm323_vm2, %v1758_v46, 0.0 }
0x125c   : > { %1766 = vadd.xlane.f32.xlu0 %v1765_v47 }
0x12e9   : > { %v1767_v49 = vpop.xlane.xlu0 %1766 }
0x12ea   : > { %v1768_v50 = vmul.f32 0.03125, %v1767_v49 }
0x12ec   : > { %v1769_v51 = vsub.f32 %v1758_v46, %v1768_v50 }
0x12ee   : > { %v1770_v52 = vmul.f32 %v1769_v51, %v1769_v51 }
0x12f0   : > { %v1771_v53 = vsel %vm323_vm2, %v1770_v52, 0.0 }
0x12f1   : > { %1772 = vadd.xlane.f32.xlu0 %v1771_v53 }
0x137e   : > { %v1773_v54 = vpop.xlane.xlu0 %1772 }
0x137f   : > { %v1774_v55 = vmul.f32 0.03125, %v1773_v54 }
0x1381   : > { %v1775_v56 = vadd.f32 1e-05, %v1774_v55 }
0x1383   : > { %2406 = vrsqrt.f32 %v1775_v56 }
0x138d   : > { %v2407_v57 = vpop.eup %2406 }
0x138e   : > { %v1777_v58 = vmul.f32 %v2407_v57, %v1769_v51 }
0x1390   : > { %v1784_v59 = vmul.f32 %v2040_v48, %v1777_v58 }
0x1392   : > { %v1788_v61 = vadd.f32 %v1786_v3, %v1784_v59 }
0x1394   : > { %1789 = vst.msk [vmem:[%s270_s15] sm:$0xff] %vm323_vm2, %v1788_v61 }
0x1395 PF: > { %s2042_s21 = sshll.u32 %s2490_s22, 7  ;;  %s1804_s27 = sshll.u32 %s270_s15, 4  ;;  %s1805_s27 = int_to_ptr.vmem [resolvable:$true] %s1804_s27 }
0x1396   : > { %s2869_s26 = scalar_lea.hbm %s2925_s5, %s2042_s21  ;;  %s2939_s7 = sand.u32 1, %s2478_s19  }
0x1397   : > { %s1791_s8 = scalar_lea.sflag [#allocation4], %s2939_s7  ;;  %s2408_s12 = scalar_lea.vmem %s1805_s27, 128 }
0x1398   : > { %p2409_p2 = scmp.ne.s32.totalorder %s1805_s27, %s2408_s12  ;;  %s2513_s20 = smov [#allocation3]  }
0x1399   : > { %s2412_s24 = sshll.u32 %s2513_s20, 4  ;;  %s2413_s24 = int_to_ptr.vmem [resolvable:$false] %s2412_s24 }
0x139a   : > { %p2410_p4 = pnand %p2409_p2, %p2593_p3  ;;  %s2414_s28 = scalar_lea.vmem %s2413_s24, 256 }
0x139b   : > { %p2415_p6 = scmp.lt.s32.totalorder %s1805_s27, %s2413_s24  ;;  %p2416_p7 = scmp.lt.s32.totalorder %s2414_s28, %s2408_s12 }
0x139c   : > { %p2411_p5 = pneg %p2410_p4 }
0x139d   : > { %p2417_p8 = por %p2416_p7, %p2415_p6 }
0x139f   : > { %p2418_p10 = pnand %p2417_p8, %p2411_p5 }
0x13a1   : > { %2421 = shalt.err (!%p2418_p10)
}
0x13a2   : > { %s2422_s22 = scalar_lea.hbm %s2869_s26, 128  ;;  %s2426_s29 = scalar_lea.hbm %s2925_s5, 256 }
0x13a3   : > { %p2423_p11 = scmp.ne.s32.totalorder %s2869_s26, %s2422_s22  ;;  %p2427_p0 = scmp.lt.u32.totalorder %s2869_s26, %s2925_s5 }
0x13a4   : > { %p2428_p1 = scmp.lt.u32.totalorder %s2426_s29, %s2422_s22  ;;  %p2430_p4 = scmp.lt.u32.totalorder %s2422_s22, %s2869_s26 }
0x13a5   : > { %p2424_p12 = pnand %p2423_p11, %p2593_p3 }
0x13a6   : > { %p2429_p2 = por %p2428_p1, %p2427_p0 }
0x13a7   : > { %p2425_p13 = pneg %p2424_p12 }
0x13a8   : > { %p2431_p5 = por %p2430_p4, %p2429_p2 }
0x13aa   : > { %p2432_p6 = pnand %p2431_p5, %p2425_p13 }
0x13ac   : > { %2435 = shalt.err (!%p2432_p6)
}
0x13ad   : > { %2276 = dma.vmem_to_hbm [thread:$0]  (%p2593_p3), %s1805_s27, 128, %s2869_s26, %s1791_s8  }
0x13ae PF: > { %p2282_p7 = scmp.ge.s32.totalorder %s2502_s25, 2  ;;  %s1816_s10 = sand.u32 1, %s2474_s18  }
0x13af   : > { %s1817_s13 = scalar_lea.sflag [#allocation4], %s1816_s10 }
0x13b0   : > { %p2279_p8 = pnand %p2282_p7, %p2603_p9 }
0x13b2   : > { %2469 = dma.done.wait (!%p2279_p8), %s1817_s13, 128  }
0x13b3   : > { %2471 = vsyncadd (!%p2279_p8), %s1817_s13, 4294967168  ;;  %s18_s25 = sadd.s32 1, %s2502_s25   ;;  %s2940_s14 = sld [smem:[#allocation6_spill]] }
0x13b4   : > { %p15_p10 = scmp.ge.s32.totalorder %s18_s25, 6   ;;  %s2941_s20 = sld [smem:[#allocation11_spill]] }
0x13b5   : > { %s2942_s21 = sld [smem:[#allocation7_spill]]  ;;  %s2943_s22 = sld [smem:[#allocation8_spill]] }
0x13b6   : > { %s2944_s23 = sld [smem:[#allocation9_spill]]  ;;  %s2945_s24 = sld [smem:[#allocation10_spill]] }
0x13b7   : > { %s2946_s18 = smov %s2478_s19  ;;  %17 = sbr.rel (!%p15_p10) target bundleno = 5 (0x5), region = 105 }
0x13b9   : > { %s2947_s19 = smov %s2940_s14 }
0x13be   :  { %1822 = vsyncpa [#allocation4], 1 }
0x13bf   :  { %1824 = vsyncpa [#allocation4 + $0x1], 1 }

</bundles_post_ra>
